<compile_context>
chip_gen: v7x
topology: tpu7x:2x2x1
jax: 0.10.0
libtpu: 0.0.40
codegen_flags: <defaults>
</compile_context>

<pallas_src>
import jax
import jax.numpy as jnp
from jax.experimental import pallas as pl
from jax.experimental.pallas import tpu as pltpu

EPS = 1e-5


def _conv_bn_relu_kernel(w_ref, x_ref, gb_ref, o_ref):
    # w_ref:  (Cblk, Cin)   1x1 conv weight (native PyTorch orientation)
    # x_ref:  (Cin, M)      transposed/flattened input (M = N*H*W)
    # gb_ref: (Cblk, 2)     column 0 = gamma, column 1 = beta
    # o_ref:  (Cblk, M)
    w = w_ref[...]
    x = x_ref[...]

    # 1x1 conv == matmul on the MXU, f32 accumulation.
    y = jnp.dot(w, x, preferred_element_type=jnp.float32)       # (Cblk, M)

    # Training-mode BatchNorm over the M = N*H*W positions (per channel).
    # Two-pass centered variance (numerically safe vs. E[y^2]-E[y]^2).
    inv_m = 1.0 / x_ref.shape[1]                                 # static
    mean = jnp.sum(y, axis=-1, keepdims=True) * inv_m            # (Cblk, 1)
    centered = y - mean
    var = jnp.sum(centered * centered, axis=-1, keepdims=True) * inv_m
    inv_std = jax.lax.rsqrt(var + EPS)

    gamma = gb_ref[:, 0:1]                                       # (Cblk, 1)
    beta = gb_ref[:, 1:2]                                        # (Cblk, 1)
    scale = gamma * inv_std

    # (y - mean) * inv_std * gamma + beta, then ReLU: one FMA + max.
    o_ref[...] = jnp.maximum(centered * scale + beta, 0.0)


def prepare_params(weight_oihw, gamma, beta):
    """One-time parameter prep (hoisted off the per-call path)."""
    cout, cin = weight_oihw.shape[0], weight_oihw.shape[1]
    w_mat = weight_oihw.reshape(cout, cin)            # pure reshape, no transpose
    gb = jnp.stack([gamma, beta], axis=-1)            # (Cout, 2)
    return w_mat, gb


def _tensorcores_per_device():
    """2 for chips whose single JAX device spans two TensorCores."""
    try:
        kind = jax.devices()[0].device_kind.lower()
    except Exception:
        return 1
    if any(tag in kind for tag in ("v4", "v5p", "v7", "7x")):
        return 2
    return 1


def conv_bn_relu(x_nchw, w_mat, gb):
    """x_nchw: (N, Cin, H, W) f32; w_mat: (Cout, Cin) f32; gb: (Cout, 2) f32."""
    n, cin, h, w = x_nchw.shape
    cout = w_mat.shape[0]
    m = n * h * w

    if n == 1:
        # NCHW with N=1 is already (Cin, H*W) contiguous -> pure reshape.
        x_t = x_nchw.reshape(cin, m)
    else:
        # General-N fallback (spec input is N=1).
        x_t = jnp.transpose(x_nchw, (1, 0, 2, 3)).reshape(cin, m)

    flops = 2 * m * cin * cout
    bytes_accessed = 4 * (cout * cin + cin * m + 2 * cout + cout * m)
    cost = pl.CostEstimate(flops=flops, transcendentals=cout,
                           bytes_accessed=bytes_accessed)

    n_cores = _tensorcores_per_device()

    if n_cores == 2 and cout % 2 == 0 and (cout // 2) % 8 == 0:
        # Split Cout across the two TensorCores; BN stats are per-channel so
        # the split is exact. x is shared (same block index every step).
        cblk = cout // 2
        out_t = pl.pallas_call(
            _conv_bn_relu_kernel,
            out_shape=jax.ShapeDtypeStruct((cout, m), jnp.float32),
            grid=(2,),
            in_specs=[
                pl.BlockSpec((cblk, cin), lambda i: (i, 0)),
                pl.BlockSpec((cin, m), lambda i: (0, 0)),
                pl.BlockSpec((cblk, 2), lambda i: (i, 0)),
            ],
            out_specs=pl.BlockSpec((cblk, m), lambda i: (i, 0)),
            cost_estimate=cost,
            compiler_params=pltpu.CompilerParams(
                dimension_semantics=("parallel",)),
        )(w_mat, x_t, gb)
    else:
        # Single TensorCore: gridless call, whole operands resident in VMEM
        # (no pipeline prologue/epilogue, no double buffering).
        vmem = pltpu.MemorySpace.VMEM
        out_t = pl.pallas_call(
            _conv_bn_relu_kernel,
            out_shape=jax.ShapeDtypeStruct((cout, m), jnp.float32),
            in_specs=[
                pl.BlockSpec(memory_space=vmem),
                pl.BlockSpec(memory_space=vmem),
                pl.BlockSpec(memory_space=vmem),
            ],
            out_specs=pl.BlockSpec(memory_space=vmem),
            cost_estimate=cost,
        )(w_mat, x_t, gb)

    if n == 1:
        return out_t.reshape(1, cout, h, w)           # pure reshape back to NCHW
    return jnp.transpose(out_t.reshape(cout, n, h, w), (1, 0, 2, 3))


def _reference(x_nchw, weight_oihw, gamma, beta):
    n, cin, h, w = x_nchw.shape
    cout = weight_oihw.shape[0]
    x_rows = jnp.transpose(x_nchw, (0, 2, 3, 1)).reshape(-1, cin)
    w_mat = jnp.transpose(weight_oihw.reshape(cout, cin), (1, 0))
    y = x_rows @ w_mat
    mean = jnp.mean(y, axis=0, keepdims=True)
    var = jnp.mean((y - mean) ** 2, axis=0, keepdims=True)
    y = (y - mean) / jnp.sqrt(var + EPS) * gamma.reshape(1, -1) + beta.reshape(1, -1)
    y = jnp.maximum(y, 0.0)
    return jnp.transpose(y.reshape(n, h, w, cout), (0, 3, 1, 2))


if __name__ == "__main__":
    key = jax.random.PRNGKey(0)
    k_x, k_w, k_g, k_b = jax.random.split(key, 4)

    N, CIN, H, W = 1, 1824, 7, 7
    COUT = 128

    x = jax.random.normal(k_x, (N, CIN, H, W), dtype=jnp.float32)
    # Conv2d weight (Cout, Cin, 1, 1), kaiming-uniform-like deterministic init
    bound = 1.0 / (CIN ** 0.5)
    weight = jax.random.uniform(k_w, (COUT, CIN, 1, 1), dtype=jnp.float32,
                                minval=-bound, maxval=bound)
    # BatchNorm affine params (deterministic, non-trivial)
    gamma = 1.0 + 0.1 * jax.random.normal(k_g, (COUT,), dtype=jnp.float32)
    beta = 0.1 * jax.random.normal(k_b, (COUT,), dtype=jnp.float32)

    w_mat, gb = prepare_params(weight, gamma, beta)     # one-time prep
    fwd = jax.jit(conv_bn_relu)

    out = fwd(x, w_mat, gb)
    out = jax.block_until_ready(out)

    ref = _reference(x, weight, gamma, beta)
    assert out.shape == (N, COUT, H, W), out.shape
    assert jnp.allclose(out, ref, atol=1e-3, rtol=1e-3), "mismatch vs reference"

    print("KERNEL_OK")
</pallas_src>

<mosaic_0001>
module attributes {stable_mosaic.version = 11 : i64} {
  func.func @_conv_bn_relu_kernel(%arg0: memref<128x1824xf32, #tpu.memory_space<vmem>>, %arg1: memref<1824x49xf32, #tpu.memory_space<vmem>>, %arg2: memref<128x2xf32, #tpu.memory_space<vmem>>, %arg3: memref<128x49xf32, #tpu.memory_space<vmem>>) attributes {dimension_semantics = [], scalar_prefetch = 0 : i64, scratch_operands = 0 : i64, tpu.core_type = #tpu.core_type<tc>} {
    %c0 = arith.constant 0 : index
    %c0_0 = arith.constant 0 : index
    %0 = vector.load %arg0[%c0, %c0_0] : memref<128x1824xf32, #tpu.memory_space<vmem>>, vector<128x1824xf32>
    %c0_1 = arith.constant 0 : index
    %c0_2 = arith.constant 0 : index
    %1 = vector.load %arg1[%c0_1, %c0_2] : memref<1824x49xf32, #tpu.memory_space<vmem>>, vector<1824x49xf32>
    %cst = arith.constant dense<0.000000e+00> : vector<128x49xf32>
    %2 = tpu.matmul %0, %1, %cst {dimension_numbers = #tpu.dot_dimension_numbers<[1], [0], [0], [1], [0, 0, 1, 1], [], []>} : vector<128x1824xf32>, vector<1824x49xf32>, vector<128x49xf32> -> vector<128x49xf32>
    %cst_3 = arith.constant dense<0.000000e+00> : vector<128xf32>
    %3 = vector.multi_reduction <add>, %2, %cst_3 [1] : vector<128x49xf32> to vector<128xf32>
    %4 = vector.shape_cast %3 : vector<128xf32> to vector<128x1xf32>
    %cst_4 = arith.constant 0.0204081628 : f32
    %5 = vector.broadcast %cst_4 : f32 to vector<128x1xf32>
    %6 = arith.mulf %4, %5 : vector<128x1xf32>
    %7 = vector.broadcast %6 : vector<128x1xf32> to vector<128x49xf32>
    %8 = arith.subf %2, %7 : vector<128x49xf32>
    %9 = arith.mulf %8, %8 : vector<128x49xf32>
    %cst_5 = arith.constant dense<0.000000e+00> : vector<128xf32>
    %10 = vector.multi_reduction <add>, %9, %cst_5 [1] : vector<128x49xf32> to vector<128xf32>
    %11 = vector.shape_cast %10 : vector<128xf32> to vector<128x1xf32>
    %cst_6 = arith.constant 0.0204081628 : f32
    %12 = vector.broadcast %cst_6 : f32 to vector<128x1xf32>
    %13 = arith.mulf %11, %12 : vector<128x1xf32>
    %cst_7 = arith.constant 9.99999974E-6 : f32
    %14 = vector.broadcast %cst_7 : f32 to vector<128x1xf32>
    %15 = arith.addf %13, %14 : vector<128x1xf32>
    %16 = math.rsqrt %15 : vector<128x1xf32>
    %c0_8 = arith.constant 0 : index
    %c0_9 = arith.constant 0 : index
    %17 = vector.load %arg2[%c0_8, %c0_9] : memref<128x2xf32, #tpu.memory_space<vmem>>, vector<128x1xf32>
    %c0_10 = arith.constant 0 : index
    %c1 = arith.constant 1 : index
    %18 = vector.load %arg2[%c0_10, %c1] : memref<128x2xf32, #tpu.memory_space<vmem>>, vector<128x1xf32>
    %19 = arith.mulf %17, %16 : vector<128x1xf32>
    %20 = vector.broadcast %19 : vector<128x1xf32> to vector<128x49xf32>
    %21 = arith.mulf %8, %20 : vector<128x49xf32>
    %22 = vector.broadcast %18 : vector<128x1xf32> to vector<128x49xf32>
    %23 = arith.addf %21, %22 : vector<128x49xf32>
    %cst_11 = arith.constant 0.000000e+00 : f32
    %24 = vector.broadcast %cst_11 : f32 to vector<128x49xf32>
    %25 = arith.maximumf %23, %24 : vector<128x49xf32>
    %c0_12 = arith.constant 0 : index
    %c0_13 = arith.constant 0 : index
    %26 = vector.load %arg3[%c0_12, %c0_13] : memref<128x49xf32, #tpu.memory_space<vmem>>, vector<128x49xf32>
    tpu.vector_store %arg3[%c0_12, %c0_13], %25 {strides = array<i32>} : memref<128x49xf32, #tpu.memory_space<vmem>>, vector<128x49xf32>,
    return
  }
}

</mosaic_0001>

<bundles_post_ra>
// kernel: conv_bn_relu.1
= control target key start
LH: loop header
LB: loop body
LE: loop exit
PB: predicated region body
PF: predicated region fallthrough
CT: control target
= control target key end

     0   :  { %vm482_vm0 = vcmask 261120   ;;  %vm1691_vm1 = vcmask 400384   ;;  %s5000_s1 = inlined_call_operand.vmem [shape: f32[1824,49], index: 1, kind: input, shape index: {}]   ;;  %s5001_s0 = inlined_call_operand.vmem [shape: f32[128,1824], index: 0, kind: input, shape index: {}]   ;;  %s5002_s2 = inlined_call_operand.vmem [shape: f32[128,2], index: 2, kind: input, shape index: {}]   ;;  %s5003_s3 = inlined_call_operand.vmem [shape: f32[128,49], index: 3, kind: output, shape index: {}]  }
   0x1   :  { %v270_v0 = vld [vmem:[%s5000_s1 + $0x80] sm:$0xff]  ;;  %v271_v1 = vld [vmem:[%s5000_s1 + $0x88] sm:$0xff]  ;;  %v272_v11 = vld [vmem:[%s5000_s1 + $0x90] sm:$0xff] }
   0x2   :  { %v302_v2 = vld [vmem:[%s5000_s1 + $0x180] sm:$0xff]  ;;  %v2772_v3 = vpack.c.bf16 %v271_v1, %v270_v0  ;;  %v303_v4 = vld [vmem:[%s5000_s1 + $0x188] sm:$0xff]  ;;  %v273_v13 = vld [vmem:[%s5000_s1 + $0x98] sm:$0xff] }
   0x3   :  { %v254_v5 = vld [vmem:[%s5000_s1] sm:$0xff]  ;;  %v255_v6 = vld [vmem:[%s5000_s1 + $0x8] sm:$0xff]  ;;  %v2804_v7 = vpack.c.bf16 %v303_v4, %v302_v2  ;;  %v304_v14 = vld [vmem:[%s5000_s1 + $0x190] sm:$0xff]  ;;  %v2776_v16 = vpack.c.bf16 %v273_v13, %v272_v11 }
   0x4   :  { %v2774_v8 = vpack.c.bf16 %v255_v6, %v254_v5  ;;  %v286_v9 = vld [vmem:[%s5000_s1 + $0x100] sm:$0xff]  ;;  %v287_v10 = vld [vmem:[%s5000_s1 + $0x108] sm:$0xff]  ;;  %2773 = vmatprep.subr.bf16.mxu0 %v2772_v3  ;;  %v305_v15 = vld [vmem:[%s5000_s1 + $0x198] sm:$0xff] }
   0x5   :  { %v2806_v12 = vpack.c.bf16 %v287_v10, %v286_v9  ;;  %2805 = vmatprep.subr.bf16.mxu1 %v2804_v7  ;;  %v2808_v17 = vpack.c.bf16 %v305_v15, %v304_v14  ;;  %v256_v18 = vld [vmem:[%s5000_s1 + $0x10] sm:$0xff]  ;;  %v257_v19 = vld [vmem:[%s5000_s1 + $0x18] sm:$0xff]  ;;  %v274_v23 = vld [vmem:[%s5000_s1 + $0xa0] sm:$0xff] }
   0x6   :  { %2775 = vmatpush3.bf16.msra.mxu0 %v2774_v8  ;;  %v288_v20 = vld [vmem:[%s5000_s1 + $0x110] sm:$0xff]  ;;  %v2778_v21 = vpack.c.bf16 %v257_v19, %v256_v18  ;;  %v289_v22 = vld [vmem:[%s5000_s1 + $0x118] sm:$0xff]  ;;  %v275_v24 = vld [vmem:[%s5000_s1 + $0xa8] sm:$0xff] }
   0x7   :  { %2807 = vmatpush3.bf16.msra.mxu1 %v2806_v12  ;;  %2777 = vmatprep.subr.bf16.mxu0 %v2776_v16  ;;  %v2810_v25 = vpack.c.bf16 %v289_v22, %v288_v20  ;;  %v2780_v26 = vpack.c.bf16 %v275_v24, %v274_v23  ;;  %v306_v27 = vld [vmem:[%s5000_s1 + $0x1a0] sm:$0xff]  ;;  %v307_v28 = vld [vmem:[%s5000_s1 + $0x1a8] sm:$0xff]  ;;  %v276_v35 = vld [vmem:[%s5000_s1 + $0xb0] sm:$0xff] }
   0x8   :  { %2809 = vmatprep.subr.bf16.mxu1 %v2808_v17  ;;  %v258_v29 = vld [vmem:[%s5000_s1 + $0x20] sm:$0xff]  ;;  %v2812_v30 = vpack.c.bf16 %v307_v28, %v306_v27  ;;  %v259_v31 = vld [vmem:[%s5000_s1 + $0x28] sm:$0xff]  ;;  %v277_v36 = vld [vmem:[%s5000_s1 + $0xb8] sm:$0xff] }
   0x9   :  { %v290_v32 = vld [vmem:[%s5000_s1 + $0x120] sm:$0xff]  ;;  %v291_v33 = vld [vmem:[%s5000_s1 + $0x128] sm:$0xff]  ;;  %v2782_v34 = vpack.c.bf16 %v259_v31, %v258_v29  ;;  %v308_v37 = vld [vmem:[%s5000_s1 + $0x1b0] sm:$0xff]  ;;  %v2784_v39 = vpack.c.bf16 %v277_v36, %v276_v35 }
   0xa   :  { %2779 = vmatpush3.bf16.msra.mxu0 %v2778_v21  ;;  %v2814_v38 = vpack.c.bf16 %v291_v33, %v290_v32  ;;  %v309_v40 = vld [vmem:[%s5000_s1 + $0x1b8] sm:$0xff]  ;;  %v260_v41 = vld [vmem:[%s5000_s1 + $0x30] sm:$0xff]  ;;  %v278_v46 = vld [vmem:[%s5000_s1 + $0xc0] sm:$0xff] }
   0xb   :  { %2811 = vmatpush3.bf16.msra.mxu1 %v2810_v25  ;;  %2781 = vmatprep.subr.bf16.mxu0 %v2780_v26  ;;  %v261_v42 = vld [vmem:[%s5000_s1 + $0x38] sm:$0xff]  ;;  %v2816_v43 = vpack.c.bf16 %v309_v40, %v308_v37  ;;  %v292_v44 = vld [vmem:[%s5000_s1 + $0x130] sm:$0xff]  ;;  %v279_v47 = vld [vmem:[%s5000_s1 + $0xc8] sm:$0xff] }
   0xc   :  { %2813 = vmatprep.subr.bf16.mxu1 %v2812_v30  ;;  %v293_v45 = vld [vmem:[%s5000_s1 + $0x138] sm:$0xff]  ;;  %v310_v48 = vld [vmem:[%s5000_s1 + $0x1c0] sm:$0xff]  ;;  %v311_v49 = vld [vmem:[%s5000_s1 + $0x1c8] sm:$0xff]  ;;  %v2786_v50 = vpack.c.bf16 %v261_v42, %v260_v41  ;;  %v2788_v52 = vpack.c.bf16 %v279_v47, %v278_v46 }
   0xd   :  { %v2818_v51 = vpack.c.bf16 %v293_v45, %v292_v44  ;;  %v262_v53 = vld [vmem:[%s5000_s1 + $0x40] sm:$0xff]  ;;  %v263_v54 = vld [vmem:[%s5000_s1 + $0x48] sm:$0xff]  ;;  %v2820_v56 = vpack.c.bf16 %v311_v49, %v310_v48  ;;  %v280_v58 = vld [vmem:[%s5000_s1 + $0xd0] sm:$0xff] }
   0xe   :  { %2783 = vmatpush3.bf16.msra.mxu0 %v2782_v34  ;;  %v294_v55 = vld [vmem:[%s5000_s1 + $0x140] sm:$0xff]  ;;  %v295_v57 = vld [vmem:[%s5000_s1 + $0x148] sm:$0xff]  ;;  %v281_v59 = vld [vmem:[%s5000_s1 + $0xd8] sm:$0xff]  ;;  %v2790_v62 = vpack.c.bf16 %v263_v54, %v262_v53 }
   0xf   :  { %2815 = vmatpush3.bf16.msra.mxu1 %v2814_v38  ;;  %2785 = vmatprep.subr.bf16.mxu0 %v2784_v39  ;;  %v312_v60 = vld [vmem:[%s5000_s1 + $0x1d0] sm:$0xff]  ;;  %v313_v61 = vld [vmem:[%s5000_s1 + $0x1d8] sm:$0xff]  ;;  %v2822_v63 = vpack.c.bf16 %v295_v57, %v294_v55  ;;  %v2792_v0 = vpack.c.bf16 %v281_v59, %v280_v58  ;;  %v282_v6 = vld [vmem:[%s5000_s1 + $0xe0] sm:$0xff] }
  0x10   :  { %2817 = vmatprep.subr.bf16.mxu1 %v2816_v43  ;;  %v264_v1 = vld [vmem:[%s5000_s1 + $0x50] sm:$0xff]  ;;  %v265_v2 = vld [vmem:[%s5000_s1 + $0x58] sm:$0xff]  ;;  %v2824_v4 = vpack.c.bf16 %v313_v61, %v312_v60  ;;  %v283_v7 = vld [vmem:[%s5000_s1 + $0xe8] sm:$0xff] }
  0x11   :  { %v296_v3 = vld [vmem:[%s5000_s1 + $0x150] sm:$0xff]  ;;  %v297_v5 = vld [vmem:[%s5000_s1 + $0x158] sm:$0xff]  ;;  %v314_v8 = vld [vmem:[%s5000_s1 + $0x1e0] sm:$0xff]  ;;  %v2794_v10 = vpack.c.bf16 %v265_v2, %v264_v1  ;;  %v2796_v14 = vpack.c.bf16 %v283_v7, %v282_v6 }
  0x12   :  { %2787 = vmatpush3.bf16.msra.mxu0 %v2786_v50  ;;  %v315_v9 = vld [vmem:[%s5000_s1 + $0x1e8] sm:$0xff]  ;;  %v266_v11 = vld [vmem:[%s5000_s1 + $0x60] sm:$0xff]  ;;  %v2826_v13 = vpack.c.bf16 %v297_v5, %v296_v3  ;;  %v17_v17 = vld [vmem:[%s5001_s0 + $0x18] sm:$0xff] }
  0x13   :  { %2819 = vmatpush3.bf16.msra.mxu1 %v2818_v51  ;;  %2789 = vmatprep.subr.bf16.mxu0 %v2788_v52  ;;  %v267_v12 = vld [vmem:[%s5000_s1 + $0x68] sm:$0xff]  ;;  %v298_v15 = vld [vmem:[%s5000_s1 + $0x160] sm:$0xff]  ;;  %v2828_v18 = vpack.c.bf16 %v315_v9, %v314_v8  ;;  %v284_v20 = vld [vmem:[%s5000_s1 + $0xf0] sm:$0xff] }
  0x14   :  { %2821 = vmatprep.subr.bf16.mxu1 %v2820_v56  ;;  %v15_v16 = vld [vmem:[%s5001_s0 + $0x8] sm:$0xff]  ;;  %v285_v21 = vld [vmem:[%s5000_s1 + $0xf8] sm:$0xff]  ;;  %v316_v22 = vld [vmem:[%s5000_s1 + $0x1f0] sm:$0xff]  ;;  %740 = vmatprep.mubr.f32.mxu1 %v17_v17  ;;  %v2798_v24 = vpack.c.bf16 %v267_v12, %v266_v11 }
  0x15   :  { %v299_v19 = vld [vmem:[%s5000_s1 + $0x168] sm:$0xff]  ;;  %595 = vmatprep.mubr.f32.mxu0 %v15_v16  ;;  %v317_v23 = vld [vmem:[%s5000_s1 + $0x1f8] sm:$0xff]  ;;  %v2800_v26 = vpack.c.bf16 %v285_v21, %v284_v20  ;;  %v268_v27 = vld [vmem:[%s5000_s1 + $0x70] sm:$0xff] }
  0x16   :  { %2791 = vmatpush3.bf16.msra.mxu0 %v2790_v62  ;;  %v2830_v25 = vpack.c.bf16 %v299_v19, %v298_v15  ;;  %v269_v28 = vld [vmem:[%s5000_s1 + $0x78] sm:$0xff]  ;;  %v300_v29 = vld [vmem:[%s5000_s1 + $0x170] sm:$0xff]  ;;  %v2832_v30 = vpack.c.bf16 %v317_v23, %v316_v22  ;;  %v334_v32 = vld [vmem:[%s5000_s1 + $0x280] sm:$0xff] }
  0x17   :  { %2823 = vmatpush3.bf16.msra.mxu1 %v2822_v63  ;;  %2793 = vmatprep.subr.bf16.mxu0 %v2792_v0  ;;  %v301_v31 = vld [vmem:[%s5000_s1 + $0x178] sm:$0xff]  ;;  %v335_v33 = vld [vmem:[%s5000_s1 + $0x288] sm:$0xff]  ;;  %v366_v34 = vld [vmem:[%s5000_s1 + $0x380] sm:$0xff]  ;;  %v2802_v36 = vpack.c.bf16 %v269_v28, %v268_v27 }
  0x18   :  { %2825 = vmatprep.subr.bf16.mxu1 %v2824_v4  ;;  %v367_v35 = vld [vmem:[%s5000_s1 + $0x388] sm:$0xff]  ;;  %v2834_v37 = vpack.c.bf16 %v301_v31, %v300_v29  ;;  %v2836_v38 = vpack.c.bf16 %v335_v33, %v334_v32  ;;  %v350_v40 = vld [vmem:[%s5000_s1 + $0x300] sm:$0xff]  ;;  %v368_v44 = vld [vmem:[%s5000_s1 + $0x390] sm:$0xff] }
  0x19   :  { %v2868_v39 = vpack.c.bf16 %v367_v35, %v366_v34  ;;  %v351_v41 = vld [vmem:[%s5000_s1 + $0x308] sm:$0xff]  ;;  %v318_v42 = vld [vmem:[%s5000_s1 + $0x200] sm:$0xff]  ;;  %v369_v45 = vld [vmem:[%s5000_s1 + $0x398] sm:$0xff] }
  0x1a   :  { %2795 = vmatpush3.bf16.msra.mxu0 %v2794_v10  ;;  %v319_v43 = vld [vmem:[%s5000_s1 + $0x208] sm:$0xff]  ;;  %v14_v46 = vld [vmem:[%s5001_s0] sm:$0xff]  ;;  %v336_v47 = vld [vmem:[%s5000_s1 + $0x290] sm:$0xff]  ;;  %v2870_v50 = vpack.c.bf16 %v351_v41, %v350_v40  ;;  %v2872_v54 = vpack.c.bf16 %v369_v45, %v368_v44 }
  0x1b   :  { %2827 = vmatpush3.bf16.msra.mxu1 %v2826_v13  ;;  %2797 = vmatprep.subr.bf16.mxu0 %v2796_v14  ;;  %v337_v48 = vld [vmem:[%s5000_s1 + $0x298] sm:$0xff]  ;;  %v16_v49 = vld [vmem:[%s5001_s0 + $0x10] sm:$0xff]  ;;  %v30_v51 = vld [vmem:[%s5001_s0 + $0x80] sm:$0xff]  ;;  %v2838_v53 = vpack.c.bf16 %v319_v43, %v318_v42 }
  0x1c   :  { %2829 = vmatprep.subr.bf16.mxu1 %v2828_v18  ;;  %v32_v52 = vld [vmem:[%s5001_s0 + $0x90] sm:$0xff]  ;;  %v353_v56 = vld [vmem:[%s5000_s1 + $0x318] sm:$0xff]  ;;  %v2840_v58 = vpack.c.bf16 %v337_v48, %v336_v47  ;;  %v370_v60 = vld [vmem:[%s5000_s1 + $0x3a0] sm:$0xff] }
  0x1d   :  { %v352_v55 = vld [vmem:[%s5000_s1 + $0x310] sm:$0xff]  ;;  %v321_v59 = vld [vmem:[%s5000_s1 + $0x218] sm:$0xff]  ;;  %v371_v61 = vld [vmem:[%s5000_s1 + $0x3a8] sm:$0xff] }
  0x1e   :  { %2799 = vmatpush3.bf16.msra.mxu0 %v2798_v24  ;;  %v320_v57 = vld [vmem:[%s5000_s1 + $0x210] sm:$0xff]  ;;  %v29_v62 = vld [vmem:[%s5001_s0 + $0x78] sm:$0xff]  ;;  %v338_v63 = vld [vmem:[%s5000_s1 + $0x2a0] sm:$0xff]  ;;  %v2874_v4 = vpack.c.bf16 %v353_v56, %v352_v55  ;;  %v2876_v6 = vpack.c.bf16 %v371_v61, %v370_v60 }
  0x1f   :  { %2831 = vmatpush3.bf16.msra.mxu1 %v2830_v25  ;;  %2801 = vmatprep.subr.bf16.mxu0 %v2800_v26  ;;  %v339_v0 = vld [vmem:[%s5000_s1 + $0x2a8] sm:$0xff]  ;;  %v45_v2 = vld [vmem:[%s5001_s0 + $0xf8] sm:$0xff]  ;;  %v2842_v5 = vpack.c.bf16 %v321_v59, %v320_v57  ;;  %v354_v7 = vld [vmem:[%s5000_s1 + $0x320] sm:$0xff] }
  0x20   :  { %2833 = vmatprep.subr.bf16.mxu1 %v2832_v30  ;;  %v31_v1 = vld [vmem:[%s5001_s0 + $0x88] sm:$0xff]  ;;  %v322_v9 = vld [vmem:[%s5000_s1 + $0x220] sm:$0xff]  ;;  %v2844_v10 = vpack.c.bf16 %v339_v0, %v338_v63  ;;  %v372_v12 = vld [vmem:[%s5000_s1 + $0x3b0] sm:$0xff] }
  0x21   :  { %v47_v3 = vld [vmem:[%s5001_s0 + $0x108] sm:$0xff]  ;;  %v373_v13 = vld [vmem:[%s5000_s1 + $0x3b8] sm:$0xff]  ;;  %v44_v14 = vld [vmem:[%s5001_s0 + $0xf0] sm:$0xff] }
  0x22   :  { %2803 = vmatpush3.bf16.msra.mxu0 %v2802_v36  ;;  %v355_v8 = vld [vmem:[%s5000_s1 + $0x328] sm:$0xff]  ;;  %v340_v15 = vld [vmem:[%s5000_s1 + $0x2b0] sm:$0xff]  ;;  %v46_v16 = vld [vmem:[%s5001_s0 + $0x100] sm:$0xff]  ;;  %v2880_v22 = vpack.c.bf16 %v373_v13, %v372_v12 }
  0x23   :  { %2835 = vmatpush3.bf16.msra.mxu1 %v2834_v37  ;;  %2837 = vmatprep.subr.bf16.mxu0 %v2836_v38  ;;  %v323_v11 = vld [vmem:[%s5000_s1 + $0x228] sm:$0xff]  ;;  %v60_v17 = vld [vmem:[%s5001_s0 + $0x170] sm:$0xff]  ;;  %v2878_v18 = vpack.c.bf16 %v355_v8, %v354_v7  ;;  %v341_v19 = vld [vmem:[%s5000_s1 + $0x2b8] sm:$0xff] }
  0x24   :  { %2869 = vmatprep.subr.bf16.mxu1 %v2868_v39  ;;  %v62_v20 = vld [vmem:[%s5001_s0 + $0x180] sm:$0xff]  ;;  %v2846_v21 = vpack.c.bf16 %v323_v11, %v322_v9  ;;  %v356_v23 = vld [vmem:[%s5000_s1 + $0x330] sm:$0xff]  ;;  %v357_v24 = vld [vmem:[%s5000_s1 + $0x338] sm:$0xff]  ;;  %v2848_v26 = vpack.c.bf16 %v341_v19, %v340_v15 }
  0x25   :  { %596 = vmatmul.mubr.f32.vlgmr.msra.gmra.mrb[0].mxu0 %v14_v46  ;;  %v59_v25 = vld [vmem:[%s5001_s0 + $0x168] sm:$0xff]  ;;  %v324_v27 = vld [vmem:[%s5000_s1 + $0x230] sm:$0xff]  ;;  %v325_v28 = vld [vmem:[%s5000_s1 + $0x238] sm:$0xff]  ;;  %v2882_v34 = vpack.c.bf16 %v357_v24, %v356_v23 }
  0x26   :  { %741 = vmatmul.mubr.f32.vlgmr.msra.gmra.mrb[0].mxu1 %v16_v49  ;;  %600 = vmatprep.mubr.f32.mxu0 %v30_v51  ;;  %v61_v29 = vld [vmem:[%s5001_s0 + $0x178] sm:$0xff]  ;;  %v374_v30 = vld [vmem:[%s5000_s1 + $0x3c0] sm:$0xff]  ;;  %v375_v31 = vld [vmem:[%s5000_s1 + $0x3c8] sm:$0xff]  ;;  %v2850_v36 = vpack.c.bf16 %v325_v28, %v324_v27 }
  0x27   :  { %2871 = vmatpush3.bf16.msra.mxu1 %v2870_v50  ;;  %745 = vmatprep.mubr.f32.mxu1 %v32_v52  ;;  %v75_v32 = vld [vmem:[%s5001_s0 + $0x1e8] sm:$0xff]  ;;  %v77_v33 = vld [vmem:[%s5001_s0 + $0x1f8] sm:$0xff]  ;;  %v358_v35 = vld [vmem:[%s5000_s1 + $0x340] sm:$0xff]  ;;  %v2884_v37 = vpack.c.bf16 %v375_v31, %v374_v30 }
  0x28   :  { %2839 = vmatpush3.bf16.msra.mxu0 %v2838_v53  ;;  %2873 = vmatprep.subr.bf16.mxu1 %v2872_v54  ;;  %v359_v38 = vld [vmem:[%s5000_s1 + $0x348] sm:$0xff]  ;;  %v342_v39 = vld [vmem:[%s5000_s1 + $0x2c0] sm:$0xff]  ;;  %v76_v45 = vld [vmem:[%s5001_s0 + $0x1f0] sm:$0xff] }
  0x29   :  { %601 = vmatmul.mubr.f32.gmra.mrb[2].mxu0 %v29_v62  ;;  %2841 = vmatprep.subr.bf16.mxu0 %v2840_v58  ;;  %v343_v40 = vld [vmem:[%s5000_s1 + $0x2c8] sm:$0xff]  ;;  %v326_v42 = vld [vmem:[%s5000_s1 + $0x240] sm:$0xff]  ;;  %v2886_v47 = vpack.c.bf16 %v359_v38, %v358_v35  ;;  %v376_v48 = vld [vmem:[%s5000_s1 + $0x3d0] sm:$0xff] }
  0x2a   :  { %746 = vmatmul.mubr.f32.gmra.mrb[2].mxu1 %v31_v1  ;;  %605 = vmatprep.mubr.f32.mxu0 %v45_v2  ;;  %v2852_v41 = vpack.c.bf16 %v343_v40, %v342_v39  ;;  %v327_v43 = vld [vmem:[%s5000_s1 + $0x248] sm:$0xff]  ;;  %v74_v44 = vld [vmem:[%s5001_s0 + $0x1e0] sm:$0xff]  ;;  %v377_v49 = vld [vmem:[%s5000_s1 + $0x3d8] sm:$0xff] }
  0x2b   :  { %750 = vmatprep.mubr.f32.mxu1 %v47_v3  ;;  %2875 = vmatpush3.bf16.msra.mxu1 %v2874_v4  ;;  %v90_v46 = vld [vmem:[%s5001_s0 + $0x260] sm:$0xff]  ;;  %v92_v50 = vld [vmem:[%s5001_s0 + $0x270] sm:$0xff]  ;;  %v2854_v51 = vpack.c.bf16 %v327_v43, %v326_v42  ;;  %v2888_v52 = vpack.c.bf16 %v377_v49, %v376_v48  ;;  %v361_v54 = vld [vmem:[%s5000_s1 + $0x358] sm:$0xff] }
  0x2c   :  { %2843 = vmatpush3.bf16.msra.mxu0 %v2842_v5  ;;  %2877 = vmatprep.subr.bf16.mxu1 %v2876_v6  ;;  %v360_v53 = vld [vmem:[%s5000_s1 + $0x350] sm:$0xff]  ;;  %v345_v56 = vld [vmem:[%s5000_s1 + $0x2d8] sm:$0xff]  ;;  %v91_v60 = vld [vmem:[%s5001_s0 + $0x268] sm:$0xff] }
  0x2d   :  { %606 = vmatmul.mubr.f32.gmra.mrb[4].mxu0 %v44_v14  ;;  %2845 = vmatprep.subr.bf16.mxu0 %v2844_v10  ;;  %v344_v55 = vld [vmem:[%s5000_s1 + $0x2d0] sm:$0xff]  ;;  %v89_v57 = vld [vmem:[%s5001_s0 + $0x258] sm:$0xff]  ;;  %v2890_v62 = vpack.c.bf16 %v361_v54, %v360_v53  ;;  %v107_v0 = vld [vmem:[%s5001_s0 + $0x2e8] sm:$0xff] }
  0x2e   :  { %751 = vmatmul.mubr.f32.gmra.mrb[4].mxu1 %v46_v16  ;;  %610 = vmatprep.mubr.f32.mxu0 %v60_v17  ;;  %v2856_v58 = vpack.c.bf16 %v345_v56, %v344_v55  ;;  %v328_v59 = vld [vmem:[%s5000_s1 + $0x250] sm:$0xff]  ;;  %v105_v61 = vld [vmem:[%s5001_s0 + $0x2d8] sm:$0xff]  ;;  %v378_v2 = vld [vmem:[%s5000_s1 + $0x3e0] sm:$0xff] }
  0x2f   :  { %755 = vmatprep.mubr.f32.mxu1 %v62_v20  ;;  %2879 = vmatpush3.bf16.msra.mxu1 %v2878_v18  ;;  %v329_v63 = vld [vmem:[%s5000_s1 + $0x258] sm:$0xff]  ;;  %v379_v3 = vld [vmem:[%s5000_s1 + $0x3e8] sm:$0xff]  ;;  %v362_v4 = vld [vmem:[%s5000_s1 + $0x360] sm:$0xff] }
  0x30   :  { %2847 = vmatpush3.bf16.msra.mxu0 %v2846_v21  ;;  %2881 = vmatprep.subr.bf16.mxu1 %v2880_v22  ;;  %v2858_v1 = vpack.c.bf16 %v329_v63, %v328_v59  ;;  %v363_v5 = vld [vmem:[%s5000_s1 + $0x368] sm:$0xff]  ;;  %v104_v6 = vld [vmem:[%s5001_s0 + $0x2d0] sm:$0xff]  ;;  %v2892_v7 = vpack.c.bf16 %v379_v3, %v378_v2  ;;  %v346_v8 = vld [vmem:[%s5000_s1 + $0x2e0] sm:$0xff] }
  0x31   :  { %611 = vmatmul.mubr.f32.gmra.mrb[6].mxu0 %v59_v25  ;;  %2849 = vmatprep.subr.bf16.mxu0 %v2848_v26  ;;  %v106_v9 = vld [vmem:[%s5001_s0 + $0x2e0] sm:$0xff]  ;;  %v120_v10 = vld [vmem:[%s5001_s0 + $0x350] sm:$0xff]  ;;  %v2894_v11 = vpack.c.bf16 %v363_v5, %v362_v4  ;;  %v347_v12 = vld [vmem:[%s5000_s1 + $0x2e8] sm:$0xff] }
  0x32   :  { %756 = vmatmul.mubr.f32.gmra.mrb[6].mxu1 %v61_v29  ;;  %615 = vmatprep.mubr.f32.mxu0 %v75_v32  ;;  %v122_v13 = vld [vmem:[%s5001_s0 + $0x360] sm:$0xff]  ;;  %v2860_v14 = vpack.c.bf16 %v347_v12, %v346_v8  ;;  %v331_v16 = vld [vmem:[%s5000_s1 + $0x268] sm:$0xff]  ;;  %v380_v18 = vld [vmem:[%s5000_s1 + $0x3f0] sm:$0xff] }
  0x33   :  { %760 = vmatprep.mubr.f32.mxu1 %v77_v33  ;;  %2883 = vmatpush3.bf16.msra.mxu1 %v2882_v34  ;;  %v330_v15 = vld [vmem:[%s5000_s1 + $0x260] sm:$0xff]  ;;  %v119_v17 = vld [vmem:[%s5001_s0 + $0x348] sm:$0xff]  ;;  %v381_v19 = vld [vmem:[%s5000_s1 + $0x3f8] sm:$0xff] }
  0x34   :  { %2851 = vmatpush3.bf16.msra.mxu0 %v2850_v36  ;;  %2885 = vmatprep.subr.bf16.mxu1 %v2884_v37  ;;  %v364_v20 = vld [vmem:[%s5000_s1 + $0x370] sm:$0xff]  ;;  %v121_v21 = vld [vmem:[%s5001_s0 + $0x358] sm:$0xff]  ;;  %v135_v22 = vld [vmem:[%s5001_s0 + $0x3c8] sm:$0xff]  ;;  %v2862_v23 = vpack.c.bf16 %v331_v16, %v330_v15  ;;  %v2896_v24 = vpack.c.bf16 %v381_v19, %v380_v18 }
  0x35   :  { %616 = vmatmul.mubr.f32.gmra.mrb[8].mxu0 %v74_v44  ;;  %2853 = vmatprep.subr.bf16.mxu0 %v2852_v41  ;;  %v365_v25 = vld [vmem:[%s5000_s1 + $0x378] sm:$0xff]  ;;  %v348_v28 = vld [vmem:[%s5000_s1 + $0x2f0] sm:$0xff]  ;;  %v134_v33 = vld [vmem:[%s5001_s0 + $0x3c0] sm:$0xff] }
  0x36   :  { %761 = vmatmul.mubr.f32.gmra.mrb[8].mxu1 %v76_v45  ;;  %620 = vmatprep.mubr.f32.mxu0 %v90_v46  ;;  %v137_v26 = vld [vmem:[%s5001_s0 + $0x3d8] sm:$0xff]  ;;  %v2898_v27 = vpack.c.bf16 %v365_v25, %v364_v20  ;;  %v332_v31 = vld [vmem:[%s5000_s1 + $0x270] sm:$0xff]  ;;  %v150_v35 = vld [vmem:[%s5001_s0 + $0x440] sm:$0xff] }
  0x37   :  { %765 = vmatprep.mubr.f32.mxu1 %v92_v50  ;;  %2887 = vmatpush3.bf16.msra.mxu1 %v2886_v47  ;;  %v349_v29 = vld [vmem:[%s5000_s1 + $0x2f8] sm:$0xff]  ;;  %v136_v34 = vld [vmem:[%s5001_s0 + $0x3d0] sm:$0xff]  ;;  %v430_v37 = vld [vmem:[%s5000_s1 + $0x580] sm:$0xff] }
  0x38   :  { %2855 = vmatpush3.bf16.msra.mxu0 %v2854_v51  ;;  %2889 = vmatprep.subr.bf16.mxu1 %v2888_v52  ;;  %v2864_v30 = vpack.c.bf16 %v349_v29, %v348_v28  ;;  %v333_v32 = vld [vmem:[%s5000_s1 + $0x278] sm:$0xff]  ;;  %v431_v38 = vld [vmem:[%s5000_s1 + $0x588] sm:$0xff]  ;;  %v152_v39 = vld [vmem:[%s5001_s0 + $0x450] sm:$0xff] }
  0x39   :  { %621 = vmatmul.mubr.f32.gmra.mrb[10].mxu0 %v89_v57  ;;  %2857 = vmatprep.subr.bf16.mxu0 %v2856_v58  ;;  %v2866_v36 = vpack.c.bf16 %v333_v32, %v332_v31  ;;  %v2932_v40 = vpack.c.bf16 %v431_v38, %v430_v37  ;;  %v398_v41 = vld [vmem:[%s5000_s1 + $0x480] sm:$0xff]  ;;  %v399_v42 = vld [vmem:[%s5000_s1 + $0x488] sm:$0xff]  ;;  %v149_v43 = vld [vmem:[%s5001_s0 + $0x438] sm:$0xff] }
  0x3a   :  { %766 = vmatmul.mubr.f32.gmra.mrb[10].mxu1 %v91_v60  ;;  %625 = vmatprep.mubr.f32.mxu0 %v105_v61  ;;  %v2900_v44 = vpack.c.bf16 %v399_v42, %v398_v41  ;;  %v151_v45 = vld [vmem:[%s5001_s0 + $0x448] sm:$0xff]  ;;  %v165_v46 = vld [vmem:[%s5001_s0 + $0x4b8] sm:$0xff]  ;;  %v164_v48 = vld [vmem:[%s5001_s0 + $0x4b0] sm:$0xff] }
  0x3b   :  { %770 = vmatprep.mubr.f32.mxu1 %v107_v0  ;;  %2891 = vmatpush3.bf16.msra.mxu1 %v2890_v62  ;;  %v167_v47 = vld [vmem:[%s5001_s0 + $0x4c8] sm:$0xff]  ;;  %v166_v49 = vld [vmem:[%s5001_s0 + $0x4c0] sm:$0xff]  ;;  %v180_v50 = vld [vmem:[%s5001_s0 + $0x530] sm:$0xff] }
  0x3c   :  { %2859 = vmatpush3.bf16.msra.mxu0 %v2858_v1  ;;  %2893 = vmatprep.subr.bf16.mxu1 %v2892_v7  ;;  %v182_v51 = vld [vmem:[%s5001_s0 + $0x540] sm:$0xff]  ;;  %v179_v52 = vld [vmem:[%s5001_s0 + $0x528] sm:$0xff]  ;;  %v181_v53 = vld [vmem:[%s5001_s0 + $0x538] sm:$0xff] }
  0x3d   :  { %626 = vmatmul.mubr.f32.gmra.mrb[12].mxu0 %v104_v6  ;;  %2861 = vmatprep.subr.bf16.mxu0 %v2860_v14  ;;  %v195_v54 = vld [vmem:[%s5001_s0 + $0x5a8] sm:$0xff]  ;;  %v197_v55 = vld [vmem:[%s5001_s0 + $0x5b8] sm:$0xff]  ;;  %v194_v56 = vld [vmem:[%s5001_s0 + $0x5a0] sm:$0xff] }
  0x3e   :  { %771 = vmatmul.mubr.f32.gmra.mrb[12].mxu1 %v106_v9  ;;  %630 = vmatprep.mubr.f32.mxu0 %v120_v10  ;;  %v196_v57 = vld [vmem:[%s5001_s0 + $0x5b0] sm:$0xff]  ;;  %v210_v58 = vld [vmem:[%s5001_s0 + $0x620] sm:$0xff]  ;;  %v209_v60 = vld [vmem:[%s5001_s0 + $0x618] sm:$0xff] }
  0x3f   :  { %775 = vmatprep.mubr.f32.mxu1 %v122_v13  ;;  %2895 = vmatpush3.bf16.msra.mxu1 %v2894_v11  ;;  %v212_v59 = vld [vmem:[%s5001_s0 + $0x630] sm:$0xff]  ;;  %v211_v61 = vld [vmem:[%s5001_s0 + $0x628] sm:$0xff]  ;;  %v225_v62 = vld [vmem:[%s5001_s0 + $0x698] sm:$0xff] }
  0x40   :  { %2897 = vmatprep.subr.bf16.mxu1 %v2896_v24  ;;  %2863 = vmatpush3.bf16.msra.mxu0 %v2862_v23  ;;  %v227_v63 = vld [vmem:[%s5001_s0 + $0x6a8] sm:$0xff]  ;;  %v224_v0 = vld [vmem:[%s5001_s0 + $0x690] sm:$0xff]  ;;  %v226_v1 = vld [vmem:[%s5001_s0 + $0x6a0] sm:$0xff] }
  0x41   :  { %631 = vmatmul.mubr.f32.gmra.mrb[14].mxu0 %v119_v17  ;;  %2865 = vmatprep.subr.bf16.mxu0 %v2864_v30  ;;  %v240_v2 = vld [vmem:[%s5001_s0 + $0x710] sm:$0xff]  ;;  %v242_v3 = vld [vmem:[%s5001_s0 + $0x720] sm:$0xff]  ;;  %v239_v4 = vld [vmem:[%s5001_s0 + $0x708] sm:$0xff] }
  0x42   :  { %776 = vmatmul.mubr.f32.gmra.mrb[14].mxu1 %v121_v21  ;;  %635 = vmatprep.mubr.f32.mxu0 %v135_v22  ;;  %v241_v5 = vld [vmem:[%s5001_s0 + $0x718] sm:$0xff]  ;;  %v19_v6 = vld [vmem:[%s5001_s0 + $0x28] sm:$0xff]  ;;  %v414_v8 = vld [vmem:[%s5000_s1 + $0x500] sm:$0xff] }
  0x43   :  { %780 = vmatprep.mubr.f32.mxu1 %v137_v26  ;;  %2899 = vmatpush3.bf16.msra.mxu1 %v2898_v27  ;;  %v21_v7 = vld [vmem:[%s5001_s0 + $0x38] sm:$0xff]  ;;  %v415_v9 = vld [vmem:[%s5000_s1 + $0x508] sm:$0xff]  ;;  %v382_v10 = vld [vmem:[%s5000_s1 + $0x400] sm:$0xff] }
  0x44   :  { %2867 = vmatpush3.bf16.msra.mxu0 %v2866_v36  ;;  %2933 = vmatprep.subr.bf16.mxu1 %v2932_v40  ;;  %v383_v11 = vld [vmem:[%s5000_s1 + $0x408] sm:$0xff]  ;;  %v432_v12 = vld [vmem:[%s5000_s1 + $0x590] sm:$0xff]  ;;  %v433_v13 = vld [vmem:[%s5000_s1 + $0x598] sm:$0xff]  ;;  %v2934_v18 = vpack.c.bf16 %v415_v9, %v414_v8 }
  0x45   :  { %636 = vmatmul.mubr.f32.gmra.mrb[16].mxu0 %v134_v33  ;;  %2901 = vmatprep.subr.bf16.mxu0 %v2900_v44  ;;  %v18_v14 = vld [vmem:[%s5001_s0 + $0x20] sm:$0xff]  ;;  %v400_v15 = vld [vmem:[%s5000_s1 + $0x490] sm:$0xff]  ;;  %v401_v16 = vld [vmem:[%s5000_s1 + $0x498] sm:$0xff]  ;;  %v2902_v21 = vpack.c.bf16 %v383_v11, %v382_v10  ;;  %v2936_v22 = vpack.c.bf16 %v433_v13, %v432_v12 }
  0x46   :  { %781 = vmatmul.mubr.f32.gmra.mrb[16].mxu1 %v136_v34  ;;  %640 = vmatprep.mubr.f32.mxu0 %v150_v35  ;;  %v20_v17 = vld [vmem:[%s5001_s0 + $0x30] sm:$0xff]  ;;  %v34_v19 = vld [vmem:[%s5001_s0 + $0xa0] sm:$0xff]  ;;  %v417_v24 = vld [vmem:[%s5000_s1 + $0x518] sm:$0xff]  ;;  %v2904_v26 = vpack.c.bf16 %v401_v16, %v400_v15 }
  0x47   :  { %785 = vmatprep.mubr.f32.mxu1 %v152_v39  ;;  %v36_v20 = vld [vmem:[%s5001_s0 + $0xb0] sm:$0xff]  ;;  %v385_v27 = vld [vmem:[%s5000_s1 + $0x418] sm:$0xff]  ;;  %v434_v28 = vld [vmem:[%s5000_s1 + $0x5a0] sm:$0xff] }
  0x48   :  { %v416_v23 = vld [vmem:[%s5000_s1 + $0x510] sm:$0xff]  ;;  %v435_v29 = vld [vmem:[%s5000_s1 + $0x5a8] sm:$0xff]  ;;  %v33_v30 = vld [vmem:[%s5001_s0 + $0x98] sm:$0xff] }
  0x49   :  { %641 = vmatmul.mubr.f32.gmra.mrb[18].mxu0 %v149_v43  ;;  %v384_v25 = vld [vmem:[%s5000_s1 + $0x410] sm:$0xff]  ;;  %v402_v31 = vld [vmem:[%s5000_s1 + $0x4a0] sm:$0xff]  ;;  %v403_v32 = vld [vmem:[%s5000_s1 + $0x4a8] sm:$0xff]  ;;  %v2938_v36 = vpack.c.bf16 %v417_v24, %v416_v23  ;;  %v2940_v38 = vpack.c.bf16 %v435_v29, %v434_v28 }
  0x4a   :  { %786 = vmatmul.mubr.f32.gmra.mrb[18].mxu1 %v151_v45  ;;  %645 = vmatprep.mubr.f32.mxu0 %v165_v46  ;;  %v35_v33 = vld [vmem:[%s5001_s0 + $0xa8] sm:$0xff]  ;;  %v49_v34 = vld [vmem:[%s5001_s0 + $0x118] sm:$0xff]  ;;  %v2906_v37 = vpack.c.bf16 %v385_v27, %v384_v25  ;;  %v418_v39 = vld [vmem:[%s5000_s1 + $0x520] sm:$0xff]  ;;  %v2908_v42 = vpack.c.bf16 %v403_v32, %v402_v31 }
  0x4b   :  { %790 = vmatprep.mubr.f32.mxu1 %v167_v47  ;;  %v51_v35 = vld [vmem:[%s5001_s0 + $0x128] sm:$0xff]  ;;  %v386_v41 = vld [vmem:[%s5000_s1 + $0x420] sm:$0xff]  ;;  %v436_v44 = vld [vmem:[%s5000_s1 + $0x5b0] sm:$0xff] }
  0x4c   :  { %v419_v40 = vld [vmem:[%s5000_s1 + $0x528] sm:$0xff]  ;;  %v437_v45 = vld [vmem:[%s5000_s1 + $0x5b8] sm:$0xff]  ;;  %v48_v46 = vld [vmem:[%s5001_s0 + $0x110] sm:$0xff] }
  0x4d   :  { %646 = vmatmul.mubr.f32.gmra.mrb[20].mxu0 %v164_v48  ;;  %v387_v43 = vld [vmem:[%s5000_s1 + $0x428] sm:$0xff]  ;;  %v404_v47 = vld [vmem:[%s5000_s1 + $0x4b0] sm:$0xff]  ;;  %v405_v48 = vld [vmem:[%s5000_s1 + $0x4b8] sm:$0xff] }
  0x4e   :  { %791 = vmatmul.mubr.f32.gmra.mrb[20].mxu1 %v166_v49  ;;  %650 = vmatprep.mubr.f32.mxu0 %v180_v50  ;;  %v50_v49 = vld [vmem:[%s5001_s0 + $0x120] sm:$0xff]  ;;  %v64_v50 = vld [vmem:[%s5001_s0 + $0x190] sm:$0xff]  ;;  %v423_v8 = vld [vmem:[%s5000_s1 + $0x548] sm:$0xff] }
  0x4f   :  { %795 = vmatprep.mubr.f32.mxu1 %v182_v51  ;;  %v66_v51 = vld [vmem:[%s5001_s0 + $0x1a0] sm:$0xff]  ;;  %v391_v11 = vld [vmem:[%s5000_s1 + $0x448] sm:$0xff]  ;;  %v440_v12 = vld [vmem:[%s5000_s1 + $0x5d0] sm:$0xff] }
  0x50   :  { %v390_v9 = vld [vmem:[%s5000_s1 + $0x440] sm:$0xff]  ;;  %v441_v13 = vld [vmem:[%s5000_s1 + $0x5d8] sm:$0xff]  ;;  %v408_v15 = vld [vmem:[%s5000_s1 + $0x4d0] sm:$0xff] }
  0x51   :  { %651 = vmatmul.mubr.f32.gmra.mrb[22].mxu0 %v179_v52  ;;  %v2942_v52 = vpack.c.bf16 %v419_v40, %v418_v39  ;;  %v409_v16 = vld [vmem:[%s5000_s1 + $0x4d8] sm:$0xff]  ;;  %v424_v23 = vld [vmem:[%s5000_s1 + $0x550] sm:$0xff]  ;;  %v442_v28 = vld [vmem:[%s5000_s1 + $0x5e0] sm:$0xff] }
  0x52   :  { %796 = vmatmul.mubr.f32.gmra.mrb[22].mxu1 %v181_v53  ;;  %655 = vmatprep.mubr.f32.mxu0 %v195_v54  ;;  %v2910_v53 = vpack.c.bf16 %v387_v43, %v386_v41  ;;  %v2944_v54 = vpack.c.bf16 %v437_v45, %v436_v44  ;;  %v425_v24 = vld [vmem:[%s5000_s1 + $0x558] sm:$0xff]  ;;  %v392_v25 = vld [vmem:[%s5000_s1 + $0x450] sm:$0xff]  ;;  %v443_v29 = vld [vmem:[%s5000_s1 + $0x5e8] sm:$0xff] }
  0x53   :  { %800 = vmatprep.mubr.f32.mxu1 %v197_v55  ;;  %v420_v55 = vld [vmem:[%s5000_s1 + $0x530] sm:$0xff]  ;;  %v393_v27 = vld [vmem:[%s5000_s1 + $0x458] sm:$0xff]  ;;  %v410_v31 = vld [vmem:[%s5000_s1 + $0x4e0] sm:$0xff] }
  0x54   :  { %v411_v32 = vld [vmem:[%s5000_s1 + $0x4e8] sm:$0xff]  ;;  %v426_v39 = vld [vmem:[%s5000_s1 + $0x560] sm:$0xff]  ;;  %v444_v44 = vld [vmem:[%s5000_s1 + $0x5f0] sm:$0xff] }
  0x55   :  { %656 = vmatmul.mubr.f32.gmra.mrb[24].mxu0 %v194_v56  ;;  %v421_v56 = vld [vmem:[%s5000_s1 + $0x538] sm:$0xff]  ;;  %v427_v40 = vld [vmem:[%s5000_s1 + $0x568] sm:$0xff]  ;;  %v394_v41 = vld [vmem:[%s5000_s1 + $0x460] sm:$0xff] }
  0x56   :  { %801 = vmatmul.mubr.f32.gmra.mrb[24].mxu1 %v196_v57  ;;  %660 = vmatprep.mubr.f32.mxu0 %v210_v58  ;;  %v388_v57 = vld [vmem:[%s5000_s1 + $0x430] sm:$0xff]  ;;  %v2912_v58 = vpack.c.bf16 %v405_v48, %v404_v47  ;;  %v395_v43 = vld [vmem:[%s5000_s1 + $0x468] sm:$0xff]  ;;  %v445_v45 = vld [vmem:[%s5000_s1 + $0x5f8] sm:$0xff] }
  0x57   :  { %805 = vmatprep.mubr.f32.mxu1 %v212_v59  ;;  %v389_v59 = vld [vmem:[%s5000_s1 + $0x438] sm:$0xff]  ;;  %v412_v47 = vld [vmem:[%s5000_s1 + $0x4f0] sm:$0xff] }
  0x58   :  { %v413_v48 = vld [vmem:[%s5000_s1 + $0x4f8] sm:$0xff] }
  0x59   :  { %661 = vmatmul.mubr.f32.gmra.mrb[26].mxu0 %v209_v60  ;;  %v438_v60 = vld [vmem:[%s5000_s1 + $0x5c0] sm:$0xff] }
  0x5a   :  { %806 = vmatmul.mubr.f32.gmra.mrb[26].mxu1 %v211_v61  ;;  %665 = vmatprep.mubr.f32.mxu0 %v225_v62  ;;  %v439_v61 = vld [vmem:[%s5000_s1 + $0x5c8] sm:$0xff] }
  0x5b   :  { %810 = vmatprep.mubr.f32.mxu1 %v227_v63  ;;  %v63_v62 = vld [vmem:[%s5001_s0 + $0x188] sm:$0xff]  ;;  %v406_v63 = vld [vmem:[%s5000_s1 + $0x4c0] sm:$0xff] }
  0x5d   :  { %666 = vmatmul.mubr.f32.gmra.mrb[28].mxu0 %v224_v0  ;;  %v407_v0 = vld [vmem:[%s5000_s1 + $0x4c8] sm:$0xff] }
  0x5e   :  { %811 = vmatmul.mubr.f32.gmra.mrb[28].mxu1 %v226_v1  ;;  %670 = vmatprep.mubr.f32.mxu0 %v240_v2  ;;  %v65_v1 = vld [vmem:[%s5001_s0 + $0x198] sm:$0xff]  ;;  %v79_v2 = vld [vmem:[%s5001_s0 + $0x208] sm:$0xff]  ;;  %v2916_v10 = vpack.c.bf16 %v407_v0, %v406_v63 }
  0x5f   :  { %815 = vmatprep.mubr.f32.mxu1 %v242_v3  ;;  %v81_v3 = vld [vmem:[%s5001_s0 + $0x218] sm:$0xff]  ;;  %v139_v0 = vld [vmem:[%s5001_s0 + $0x3e8] sm:$0xff] }
  0x60   :  { %v125_v63 = vld [vmem:[%s5001_s0 + $0x378] sm:$0xff] }
  0x61   :  { %671 = vmatmul.mubr.f32.gmra.mrb[30].mxu0 %v239_v4  ;;  %v2946_v4 = vpack.c.bf16 %v421_v56, %v420_v55  ;;  %v428_v55 = vld [vmem:[%s5000_s1 + $0x570] sm:$0xff]  ;;  %v429_v56 = vld [vmem:[%s5000_s1 + $0x578] sm:$0xff] }
  0x62   :  { %816 = vmatmul.mubr.f32.gmra.mrb[30].mxu1 %v241_v5  ;;  %885 = vmatprep.mubr.f32.mxu0 %v19_v6  ;;  %v2914_v5 = vpack.c.bf16 %v389_v59, %v388_v57  ;;  %v2948_v6 = vpack.c.bf16 %v439_v61, %v438_v60  ;;  %v396_v57 = vld [vmem:[%s5000_s1 + $0x470] sm:$0xff]  ;;  %v397_v59 = vld [vmem:[%s5000_s1 + $0x478] sm:$0xff]  ;;  %v462_v60 = vld [vmem:[%s5000_s1 + $0x680] sm:$0xff] }
  0x63   :  { %1030 = vmatprep.mubr.f32.mxu1 %v21_v7  ;;  %v422_v7 = vld [vmem:[%s5000_s1 + $0x540] sm:$0xff]  ;;  %v463_v61 = vld [vmem:[%s5000_s1 + $0x688] sm:$0xff] }
  0x65   :  { %886 = vmatmul.mubr.f32.vlgmr.msra.gmra.mrb[32].mxu0 %v18_v14  ;;  %v78_v14 = vld [vmem:[%s5001_s0 + $0x200] sm:$0xff] }
  0x66   :  { %1031 = vmatmul.mubr.f32.vlgmr.msra.gmra.mrb[32].mxu1 %v20_v17  ;;  %890 = vmatprep.mubr.f32.mxu0 %v34_v19  ;;  %v80_v17 = vld [vmem:[%s5001_s0 + $0x210] sm:$0xff] }
  0x67   :  { %2935 = vmatpush3.bf16.msra.mxu1 %v2934_v18  ;;  %1035 = vmatprep.mubr.f32.mxu1 %v36_v20  ;;  %v94_v18 = vld [vmem:[%s5001_s0 + $0x280] sm:$0xff]  ;;  %v96_v19 = vld [vmem:[%s5001_s0 + $0x290] sm:$0xff]  ;;  %v2950_v20 = vpack.c.bf16 %v423_v8, %v422_v7 }
  0x68   :  { %2903 = vmatpush3.bf16.msra.mxu0 %v2902_v21  ;;  %2937 = vmatprep.subr.bf16.mxu1 %v2936_v22  ;;  %v2918_v21 = vpack.c.bf16 %v391_v11, %v390_v9  ;;  %v2952_v22 = vpack.c.bf16 %v441_v13, %v440_v12  ;;  %v154_v7 = vld [vmem:[%s5001_s0 + $0x460] sm:$0xff]  ;;  %v156_v8 = vld [vmem:[%s5001_s0 + $0x470] sm:$0xff]  ;;  %v153_v9 = vld [vmem:[%s5001_s0 + $0x458] sm:$0xff] }
  0x69   :  { %891 = vmatmul.mubr.f32.gmra.mrb[34].mxu0 %v33_v30  ;;  %2905 = vmatprep.subr.bf16.mxu0 %v2904_v26  ;;  %v2920_v26 = vpack.c.bf16 %v409_v16, %v408_v15  ;;  %v93_v30 = vld [vmem:[%s5001_s0 + $0x278] sm:$0xff]  ;;  %v171_v12 = vld [vmem:[%s5001_s0 + $0x4e8] sm:$0xff]  ;;  %v168_v13 = vld [vmem:[%s5001_s0 + $0x4d0] sm:$0xff] }
  0x6a   :  { %1036 = vmatmul.mubr.f32.gmra.mrb[34].mxu1 %v35_v33  ;;  %895 = vmatprep.mubr.f32.mxu0 %v49_v34  ;;  %v95_v33 = vld [vmem:[%s5001_s0 + $0x288] sm:$0xff]  ;;  %v109_v34 = vld [vmem:[%s5001_s0 + $0x2f8] sm:$0xff]  ;;  %v184_v15 = vld [vmem:[%s5001_s0 + $0x550] sm:$0xff] }
  0x6b   :  { %1040 = vmatprep.mubr.f32.mxu1 %v51_v35  ;;  %2939 = vmatpush3.bf16.msra.mxu1 %v2938_v36  ;;  %v111_v35 = vld [vmem:[%s5001_s0 + $0x308] sm:$0xff]  ;;  %v2954_v36 = vpack.c.bf16 %v425_v24, %v424_v23  ;;  %v169_v11 = vld [vmem:[%s5001_s0 + $0x4d8] sm:$0xff]  ;;  %v186_v16 = vld [vmem:[%s5001_s0 + $0x560] sm:$0xff] }
  0x6c   :  { %2907 = vmatpush3.bf16.msra.mxu0 %v2906_v37  ;;  %2941 = vmatprep.subr.bf16.mxu1 %v2940_v38  ;;  %v2922_v37 = vpack.c.bf16 %v393_v27, %v392_v25  ;;  %v2956_v38 = vpack.c.bf16 %v443_v29, %v442_v28  ;;  %v214_v23 = vld [vmem:[%s5001_s0 + $0x640] sm:$0xff]  ;;  %v216_v24 = vld [vmem:[%s5001_s0 + $0x650] sm:$0xff]  ;;  %v213_v25 = vld [vmem:[%s5001_s0 + $0x638] sm:$0xff] }
  0x6d   :  { %896 = vmatmul.mubr.f32.gmra.mrb[36].mxu0 %v48_v46  ;;  %2909 = vmatprep.subr.bf16.mxu0 %v2908_v42  ;;  %v2924_v42 = vpack.c.bf16 %v411_v32, %v410_v31  ;;  %v108_v46 = vld [vmem:[%s5001_s0 + $0x2f0] sm:$0xff]  ;;  %v229_v27 = vld [vmem:[%s5001_s0 + $0x6b8] sm:$0xff]  ;;  %v231_v28 = vld [vmem:[%s5001_s0 + $0x6c8] sm:$0xff] }
  0x6e   :  { %1041 = vmatmul.mubr.f32.gmra.mrb[36].mxu1 %v50_v49  ;;  %900 = vmatprep.mubr.f32.mxu0 %v64_v50  ;;  %v110_v49 = vld [vmem:[%s5001_s0 + $0x300] sm:$0xff]  ;;  %v124_v50 = vld [vmem:[%s5001_s0 + $0x370] sm:$0xff] }
  0x6f   :  { %1045 = vmatprep.mubr.f32.mxu1 %v66_v51  ;;  %2943 = vmatpush3.bf16.msra.mxu1 %v2942_v52  ;;  %v126_v51 = vld [vmem:[%s5001_s0 + $0x380] sm:$0xff]  ;;  %v2958_v52 = vpack.c.bf16 %v427_v40, %v426_v39  ;;  %v228_v29 = vld [vmem:[%s5001_s0 + $0x6b0] sm:$0xff]  ;;  %v465_v40 = vld [vmem:[%s5000_s1 + $0x698] sm:$0xff] }
  0x70   :  { %2911 = vmatpush3.bf16.msra.mxu0 %v2910_v53  ;;  %2945 = vmatprep.subr.bf16.mxu1 %v2944_v54  ;;  %v2926_v53 = vpack.c.bf16 %v395_v43, %v394_v41  ;;  %v2960_v54 = vpack.c.bf16 %v445_v45, %v444_v44  ;;  %v244_v31 = vld [vmem:[%s5001_s0 + $0x730] sm:$0xff]  ;;  %v246_v32 = vld [vmem:[%s5001_s0 + $0x740] sm:$0xff] }
  0x71   :  { %901 = vmatmul.mubr.f32.gmra.mrb[38].mxu0 %v63_v62  ;;  %2913 = vmatprep.subr.bf16.mxu0 %v2912_v58  ;;  %v2928_v58 = vpack.c.bf16 %v413_v48, %v412_v47  ;;  %v123_v62 = vld [vmem:[%s5001_s0 + $0x368] sm:$0xff]  ;;  %v464_v39 = vld [vmem:[%s5000_s1 + $0x690] sm:$0xff]  ;;  %v22_v41 = vld [vmem:[%s5001_s0 + $0x40] sm:$0xff] }
  0x72   :  { %1046 = vmatmul.mubr.f32.gmra.mrb[38].mxu1 %v65_v1  ;;  %905 = vmatprep.mubr.f32.mxu0 %v79_v2  ;;  %v2962_v1 = vpack.c.bf16 %v429_v56, %v428_v55  ;;  %v141_v2 = vld [vmem:[%s5001_s0 + $0x3f8] sm:$0xff]  ;;  %v38_v44 = vld [vmem:[%s5001_s0 + $0xc0] sm:$0xff]  ;;  %v40_v45 = vld [vmem:[%s5001_s0 + $0xd0] sm:$0xff] }
  0x73   :  { %1050 = vmatprep.mubr.f32.mxu1 %v81_v3  ;;  %2947 = vmatpush3.bf16.msra.mxu1 %v2946_v4  ;;  %v2930_v3 = vpack.c.bf16 %v397_v59, %v396_v57  ;;  %v2964_v4 = vpack.c.bf16 %v463_v61, %v462_v60  ;;  %v448_v47 = vld [vmem:[%s5000_s1 + $0x610] sm:$0xff]  ;;  %v449_v48 = vld [vmem:[%s5000_s1 + $0x618] sm:$0xff]  ;;  %v55_v55 = vld [vmem:[%s5001_s0 + $0x148] sm:$0xff] }
  0x74   :  { %2915 = vmatpush3.bf16.msra.mxu0 %v2914_v5  ;;  %2949 = vmatprep.subr.bf16.mxu1 %v2948_v6  ;;  %v138_v5 = vld [vmem:[%s5001_s0 + $0x3e0] sm:$0xff]  ;;  %v140_v6 = vld [vmem:[%s5001_s0 + $0x3f0] sm:$0xff]  ;;  %v469_v60 = vld [vmem:[%s5000_s1 + $0x6b8] sm:$0xff] }
  0x75   :  { %906 = vmatmul.mubr.f32.gmra.mrb[40].mxu0 %v78_v14  ;;  %2917 = vmatprep.subr.bf16.mxu0 %v2916_v10  ;;  %v155_v10 = vld [vmem:[%s5001_s0 + $0x468] sm:$0xff]  ;;  %v170_v14 = vld [vmem:[%s5001_s0 + $0x4e0] sm:$0xff]  ;;  %v468_v59 = vld [vmem:[%s5000_s1 + $0x6b0] sm:$0xff] }
  0x76   :  { %1051 = vmatmul.mubr.f32.gmra.mrb[40].mxu1 %v80_v17  ;;  %910 = vmatprep.mubr.f32.mxu0 %v94_v18  ;;  %v183_v17 = vld [vmem:[%s5001_s0 + $0x548] sm:$0xff]  ;;  %v185_v18 = vld [vmem:[%s5001_s0 + $0x558] sm:$0xff]  ;;  %v450_v57 = vld [vmem:[%s5000_s1 + $0x620] sm:$0xff] }
  0x77   :  { %1055 = vmatprep.mubr.f32.mxu1 %v96_v19  ;;  %2951 = vmatpush3.bf16.msra.mxu1 %v2950_v20  ;;  %v199_v19 = vld [vmem:[%s5001_s0 + $0x5c8] sm:$0xff]  ;;  %v201_v20 = vld [vmem:[%s5001_s0 + $0x5d8] sm:$0xff]  ;;  %v52_v61 = vld [vmem:[%s5001_s0 + $0x130] sm:$0xff] }
  0x78   :  { %2919 = vmatpush3.bf16.msra.mxu0 %v2918_v21  ;;  %2953 = vmatprep.subr.bf16.mxu1 %v2952_v22  ;;  %v198_v21 = vld [vmem:[%s5001_s0 + $0x5c0] sm:$0xff]  ;;  %v200_v22 = vld [vmem:[%s5001_s0 + $0x5d0] sm:$0xff] }
  0x79   :  { %911 = vmatmul.mubr.f32.gmra.mrb[42].mxu0 %v93_v30  ;;  %2921 = vmatprep.subr.bf16.mxu0 %v2920_v26  ;;  %v215_v26 = vld [vmem:[%s5001_s0 + $0x648] sm:$0xff]  ;;  %v230_v30 = vld [vmem:[%s5001_s0 + $0x6c0] sm:$0xff] }
  0x7a   :  { %1056 = vmatmul.mubr.f32.gmra.mrb[42].mxu1 %v95_v33  ;;  %915 = vmatprep.mubr.f32.mxu0 %v109_v34  ;;  %v243_v33 = vld [vmem:[%s5001_s0 + $0x728] sm:$0xff]  ;;  %v245_v34 = vld [vmem:[%s5001_s0 + $0x738] sm:$0xff] }
  0x7b   :  { %1060 = vmatprep.mubr.f32.mxu1 %v111_v35  ;;  %2955 = vmatpush3.bf16.msra.mxu1 %v2954_v36  ;;  %v23_v35 = vld [vmem:[%s5001_s0 + $0x48] sm:$0xff]  ;;  %v25_v36 = vld [vmem:[%s5001_s0 + $0x58] sm:$0xff] }
  0x7c   :  { %2923 = vmatpush3.bf16.msra.mxu0 %v2922_v37  ;;  %2957 = vmatprep.subr.bf16.mxu1 %v2956_v38  ;;  %v446_v37 = vld [vmem:[%s5000_s1 + $0x600] sm:$0xff]  ;;  %v447_v38 = vld [vmem:[%s5000_s1 + $0x608] sm:$0xff] }
  0x7d   :  { %916 = vmatmul.mubr.f32.gmra.mrb[44].mxu0 %v108_v46  ;;  %2925 = vmatprep.subr.bf16.mxu0 %v2924_v42  ;;  %v24_v42 = vld [vmem:[%s5001_s0 + $0x50] sm:$0xff]  ;;  %v2966_v43 = vpack.c.bf16 %v447_v38, %v446_v37  ;;  %v2968_v46 = vpack.c.bf16 %v465_v40, %v464_v39  ;;  %v114_v38 = vld [vmem:[%s5001_s0 + $0x320] sm:$0xff] }
  0x7e   :  { %1061 = vmatmul.mubr.f32.gmra.mrb[44].mxu1 %v110_v49  ;;  %920 = vmatprep.mubr.f32.mxu0 %v124_v50  ;;  %v466_v49 = vld [vmem:[%s5000_s1 + $0x6a0] sm:$0xff]  ;;  %v467_v50 = vld [vmem:[%s5000_s1 + $0x6a8] sm:$0xff]  ;;  %v112_v37 = vld [vmem:[%s5001_s0 + $0x310] sm:$0xff] }
  0x7f   :  { %1065 = vmatprep.mubr.f32.mxu1 %v126_v51  ;;  %2959 = vmatpush3.bf16.msra.mxu1 %v2958_v52  ;;  %v37_v51 = vld [vmem:[%s5001_s0 + $0xb8] sm:$0xff]  ;;  %v39_v52 = vld [vmem:[%s5001_s0 + $0xc8] sm:$0xff]  ;;  %v2972_v56 = vpack.c.bf16 %v467_v50, %v466_v49  ;;  %v128_v39 = vld [vmem:[%s5001_s0 + $0x390] sm:$0xff] }
  0x80   :  { %2927 = vmatpush3.bf16.msra.mxu0 %v2926_v53  ;;  %2961 = vmatprep.subr.bf16.mxu1 %v2960_v54  ;;  %v53_v53 = vld [vmem:[%s5001_s0 + $0x138] sm:$0xff]  ;;  %v2970_v54 = vpack.c.bf16 %v449_v48, %v448_v47  ;;  %v127_v47 = vld [vmem:[%s5001_s0 + $0x388] sm:$0xff] }
  0x81   :  { %921 = vmatmul.mubr.f32.gmra.mrb[46].mxu0 %v123_v62  ;;  %2929 = vmatprep.subr.bf16.mxu0 %v2928_v58  ;;  %v451_v58 = vld [vmem:[%s5000_s1 + $0x628] sm:$0xff]  ;;  %v54_v62 = vld [vmem:[%s5001_s0 + $0x140] sm:$0xff]  ;;  %v129_v48 = vld [vmem:[%s5001_s0 + $0x398] sm:$0xff] }
  0x82   :  { %1066 = vmatmul.mubr.f32.gmra.mrb[46].mxu1 %v125_v63  ;;  %925 = vmatprep.mubr.f32.mxu0 %v139_v0  ;;  %v68_v63 = vld [vmem:[%s5001_s0 + $0x1b0] sm:$0xff]  ;;  %v2974_v0 = vpack.c.bf16 %v451_v58, %v450_v57  ;;  %v143_v49 = vld [vmem:[%s5001_s0 + $0x408] sm:$0xff]  ;;  %v157_v57 = vld [vmem:[%s5001_s0 + $0x478] sm:$0xff] }
  0x83   :  { %1070 = vmatprep.mubr.f32.mxu1 %v141_v2  ;;  %2963 = vmatpush3.bf16.msra.mxu1 %v2962_v1  ;;  %v70_v1 = vld [vmem:[%s5001_s0 + $0x1c0] sm:$0xff]  ;;  %v2976_v2 = vpack.c.bf16 %v469_v60, %v468_v59  ;;  %v159_v58 = vld [vmem:[%s5001_s0 + $0x488] sm:$0xff]  ;;  %v173_v59 = vld [vmem:[%s5001_s0 + $0x4f8] sm:$0xff] }
  0x84   :  { %2931 = vmatpush3.bf16.msra.mxu0 %v2930_v3  ;;  %3004 = vmatprep.subr.bf16.mxu1 %v2964_v4  ;;  %v452_v3 = vld [vmem:[%s5000_s1 + $0x630] sm:$0xff]  ;;  %v175_v60 = vld [vmem:[%s5001_s0 + $0x508] sm:$0xff] }
  0x85   :  { %926 = vmatmul.mubr.f32.gmra.mrb[48].mxu0 %v138_v5  ;;  %2965 = vmatprep.subr.bf16.mxu0 %v2964_v4  ;;  %v453_v4 = vld [vmem:[%s5000_s1 + $0x638] sm:$0xff]  ;;  %v470_v5 = vld [vmem:[%s5000_s1 + $0x6c0] sm:$0xff] }
  0x86   :  { %1071 = vmatmul.mubr.f32.gmra.mrb[48].mxu1 %v140_v6  ;;  %930 = vmatprep.mubr.f32.mxu0 %v154_v7  ;;  %v471_v6 = vld [vmem:[%s5000_s1 + $0x6c8] sm:$0xff] }
  0x87   :  { %1075 = vmatprep.mubr.f32.mxu1 %v156_v8  ;;  %v67_v7 = vld [vmem:[%s5001_s0 + $0x1a8] sm:$0xff]  ;;  %v69_v8 = vld [vmem:[%s5001_s0 + $0x1b8] sm:$0xff] }
  0x89   :  { %931 = vmatmul.mubr.f32.gmra.mrb[50].mxu0 %v153_v9  ;;  %v83_v9 = vld [vmem:[%s5001_s0 + $0x228] sm:$0xff] }
  0x8a   :  { %1076 = vmatmul.mubr.f32.gmra.mrb[50].mxu1 %v155_v10  ;;  %935 = vmatprep.mubr.f32.mxu0 %v169_v11  ;;  %v2978_v10 = vpack.c.bf16 %v453_v4, %v452_v3  ;;  %v85_v11 = vld [vmem:[%s5001_s0 + $0x238] sm:$0xff]  ;;  %v203_v3 = vld [vmem:[%s5001_s0 + $0x5e8] sm:$0xff] }
  0x8b   :  { %1080 = vmatprep.mubr.f32.mxu1 %v171_v12  ;;  %v2980_v12 = vpack.c.bf16 %v471_v6, %v470_v5  ;;  %v205_v4 = vld [vmem:[%s5001_s0 + $0x5f8] sm:$0xff]  ;;  %v202_v5 = vld [vmem:[%s5001_s0 + $0x5e0] sm:$0xff]  ;;  %v204_v6 = vld [vmem:[%s5001_s0 + $0x5f0] sm:$0xff] }
  0x8d   :  { %936 = vmatmul.mubr.f32.gmra.mrb[52].mxu0 %v168_v13  ;;  %v454_v13 = vld [vmem:[%s5000_s1 + $0x640] sm:$0xff] }
  0x8e   :  { %1081 = vmatmul.mubr.f32.gmra.mrb[52].mxu1 %v170_v14  ;;  %940 = vmatprep.mubr.f32.mxu0 %v184_v15  ;;  %v455_v14 = vld [vmem:[%s5000_s1 + $0x648] sm:$0xff]  ;;  %v472_v15 = vld [vmem:[%s5000_s1 + $0x6d0] sm:$0xff] }
  0x8f   :  { %1085 = vmatprep.mubr.f32.mxu1 %v186_v16  ;;  %v473_v16 = vld [vmem:[%s5000_s1 + $0x6d8] sm:$0xff] }
  0x91   :  { %941 = vmatmul.mubr.f32.gmra.mrb[54].mxu0 %v183_v17  ;;  %v82_v17 = vld [vmem:[%s5001_s0 + $0x220] sm:$0xff] }
  0x92   :  { %1086 = vmatmul.mubr.f32.gmra.mrb[54].mxu1 %v185_v18  ;;  %945 = vmatprep.mubr.f32.mxu0 %v199_v19  ;;  %v84_v18 = vld [vmem:[%s5001_s0 + $0x230] sm:$0xff]  ;;  %v98_v19 = vld [vmem:[%s5001_s0 + $0x2a0] sm:$0xff] }
  0x93   :  { %1090 = vmatprep.mubr.f32.mxu1 %v201_v20  ;;  %v2982_v20 = vpack.c.bf16 %v455_v14, %v454_v13  ;;  %v232_v13 = vld [vmem:[%s5001_s0 + $0x6d0] sm:$0xff]  ;;  %v234_v14 = vld [vmem:[%s5001_s0 + $0x6e0] sm:$0xff] }
  0x95   :  { %946 = vmatmul.mubr.f32.gmra.mrb[56].mxu0 %v198_v21  ;;  %v100_v21 = vld [vmem:[%s5001_s0 + $0x2b0] sm:$0xff] }
  0x96   :  { %1091 = vmatmul.mubr.f32.gmra.mrb[56].mxu1 %v200_v22  ;;  %950 = vmatprep.mubr.f32.mxu0 %v214_v23  ;;  %v2984_v22 = vpack.c.bf16 %v473_v16, %v472_v15  ;;  %v456_v23 = vld [vmem:[%s5000_s1 + $0x650] sm:$0xff]  ;;  %v250_v16 = vld [vmem:[%s5001_s0 + $0x760] sm:$0xff] }
  0x97   :  { %1095 = vmatprep.mubr.f32.mxu1 %v216_v24  ;;  %v457_v24 = vld [vmem:[%s5000_s1 + $0x658] sm:$0xff]  ;;  %v248_v15 = vld [vmem:[%s5001_s0 + $0x750] sm:$0xff] }
  0x99   :  { %951 = vmatmul.mubr.f32.gmra.mrb[58].mxu0 %v213_v25  ;;  %v474_v25 = vld [vmem:[%s5000_s1 + $0x6e0] sm:$0xff] }
  0x9a   :  { %1096 = vmatmul.mubr.f32.gmra.mrb[58].mxu1 %v215_v26  ;;  %955 = vmatprep.mubr.f32.mxu0 %v229_v27  ;;  %v475_v26 = vld [vmem:[%s5000_s1 + $0x6e8] sm:$0xff]  ;;  %v97_v27 = vld [vmem:[%s5001_s0 + $0x298] sm:$0xff] }
  0x9b   :  { %1100 = vmatprep.mubr.f32.mxu1 %v231_v28  ;;  %v99_v28 = vld [vmem:[%s5001_s0 + $0x2a8] sm:$0xff] }
  0x9d   :  { %956 = vmatmul.mubr.f32.gmra.mrb[60].mxu0 %v228_v29  ;;  %v113_v29 = vld [vmem:[%s5001_s0 + $0x318] sm:$0xff] }
  0x9e   :  { %1101 = vmatmul.mubr.f32.gmra.mrb[60].mxu1 %v230_v30  ;;  %960 = vmatprep.mubr.f32.mxu0 %v244_v31  ;;  %v2986_v30 = vpack.c.bf16 %v457_v24, %v456_v23  ;;  %v115_v31 = vld [vmem:[%s5001_s0 + $0x328] sm:$0xff]  ;;  %v26_v23 = vld [vmem:[%s5001_s0 + $0x60] sm:$0xff] }
  0x9f   :  { %1105 = vmatprep.mubr.f32.mxu1 %v246_v32  ;;  %v2988_v32 = vpack.c.bf16 %v475_v26, %v474_v25  ;;  %v206_v24 = vld [vmem:[%s5001_s0 + $0x600] sm:$0xff] }
  0xa0   :  { %v42_v25 = vld [vmem:[%s5001_s0 + $0xe0] sm:$0xff] }
  0xa1   :  { %961 = vmatmul.mubr.f32.gmra.mrb[62].mxu0 %v243_v33  ;;  %v458_v33 = vld [vmem:[%s5000_s1 + $0x660] sm:$0xff] }
  0xa2   :  { %1106 = vmatmul.mubr.f32.gmra.mrb[62].mxu1 %v245_v34  ;;  %1175 = vmatprep.mubr.f32.mxu0 %v23_v35  ;;  %v459_v34 = vld [vmem:[%s5000_s1 + $0x668] sm:$0xff]  ;;  %v476_v35 = vld [vmem:[%s5000_s1 + $0x6f0] sm:$0xff]  ;;  %v222_v26 = vld [vmem:[%s5001_s0 + $0x680] sm:$0xff] }
  0xa3   :  { %1320 = vmatprep.mubr.f32.mxu1 %v25_v36  ;;  %v477_v36 = vld [vmem:[%s5000_s1 + $0x6f8] sm:$0xff]  ;;  %v2990_v40 = vpack.c.bf16 %v459_v34, %v458_v33  ;;  %v236_v33 = vld [vmem:[%s5001_s0 + $0x6f0] sm:$0xff] }
  0xa4   :  { %v72_v34 = vld [vmem:[%s5001_s0 + $0x1d0] sm:$0xff] }
  0xa5   :  { %1176 = vmatmul.mubr.f32.vlgmr.msra.gmra.mrb[64].mxu0 %v22_v41  ;;  %v130_v41 = vld [vmem:[%s5001_s0 + $0x3a0] sm:$0xff] }
  0xa6   :  { %1321 = vmatmul.mubr.f32.vlgmr.msra.gmra.mrb[64].mxu1 %v24_v42  ;;  %1180 = vmatprep.mubr.f32.mxu0 %v38_v44  ;;  %v2992_v42 = vpack.c.bf16 %v477_v36, %v476_v35  ;;  %v461_v44 = vld [vmem:[%s5000_s1 + $0x678] sm:$0xff]  ;;  %v252_v35 = vld [vmem:[%s5001_s0 + $0x770] sm:$0xff]  ;;  %v71_v36 = vld [vmem:[%s5001_s0 + $0x1c8] sm:$0xff] }
  0xa7   :  { %3012 = vmatpush3.bf16.msra.mxu1 %v2966_v43  ;;  %1325 = vmatprep.mubr.f32.mxu1 %v40_v45  ;;  %v478_v45 = vld [vmem:[%s5000_s1 + $0x700] sm:$0xff] }
  0xa8   :  { %2967 = vmatpush3.bf16.msra.mxu0 %v2966_v43  ;;  %3005 = vmatprep.subr.bf16.mxu1 %v2968_v46  ;;  %v460_v43 = vld [vmem:[%s5000_s1 + $0x670] sm:$0xff] }
  0xa9   :  { %1181 = vmatmul.mubr.f32.gmra.mrb[66].mxu0 %v37_v51  ;;  %2969 = vmatprep.subr.bf16.mxu0 %v2968_v46  ;;  %v479_v46 = vld [vmem:[%s5000_s1 + $0x708] sm:$0xff]  ;;  %v2994_v50 = vpack.c.bf16 %v461_v44, %v460_v43  ;;  %v145_v51 = vld [vmem:[%s5001_s0 + $0x418] sm:$0xff]  ;;  %v58_v43 = vld [vmem:[%s5001_s0 + $0x160] sm:$0xff] }
  0xaa   :  { %1326 = vmatmul.mubr.f32.gmra.mrb[66].mxu1 %v39_v52  ;;  %1185 = vmatprep.mubr.f32.mxu0 %v53_v53  ;;  %v4246_v52 = vpack.c.bf16 %v479_v46, %v478_v45  ;;  %v142_v53 = vld [vmem:[%s5001_s0 + $0x400] sm:$0xff]  ;;  %v101_v44 = vld [vmem:[%s5001_s0 + $0x2b8] sm:$0xff] }
  0xab   :  { %1330 = vmatprep.mubr.f32.mxu1 %v55_v55  ;;  %3013 = vmatpush3.bf16.msra.mxu1 %v2970_v54  ;;  %v158_v55 = vld [vmem:[%s5001_s0 + $0x480] sm:$0xff]  ;;  %v73_v45 = vld [vmem:[%s5001_s0 + $0x1d8] sm:$0xff] }
  0xac   :  { %2971 = vmatpush3.bf16.msra.mxu0 %v2970_v54  ;;  %3006 = vmatprep.subr.bf16.mxu1 %v2972_v56  ;;  %v144_v54 = vld [vmem:[%s5001_s0 + $0x410] sm:$0xff]  ;;  %v117_v46 = vld [vmem:[%s5001_s0 + $0x338] sm:$0xff] }
  0xad   :  { %1186 = vmatmul.mubr.f32.gmra.mrb[68].mxu0 %v52_v61  ;;  %2973 = vmatprep.subr.bf16.mxu0 %v2972_v56  ;;  %v160_v56 = vld [vmem:[%s5001_s0 + $0x490] sm:$0xff] }
  0xae   :  { %1331 = vmatmul.mubr.f32.gmra.mrb[68].mxu1 %v54_v62  ;;  %1190 = vmatprep.mubr.f32.mxu0 %v68_v63  ;;  %v172_v61 = vld [vmem:[%s5001_s0 + $0x4f0] sm:$0xff]  ;;  %v174_v62 = vld [vmem:[%s5001_s0 + $0x500] sm:$0xff] }
  0xaf   :  { %1335 = vmatprep.mubr.f32.mxu1 %v70_v1  ;;  %3014 = vmatpush3.bf16.msra.mxu1 %v2974_v0  ;;  %v188_v63 = vld [vmem:[%s5001_s0 + $0x570] sm:$0xff]  ;;  %v187_v1 = vld [vmem:[%s5001_s0 + $0x568] sm:$0xff] }
  0xb0   :  { %2975 = vmatpush3.bf16.msra.mxu0 %v2974_v0  ;;  %3007 = vmatprep.subr.bf16.mxu1 %v2976_v2  ;;  %v190_v0 = vld [vmem:[%s5001_s0 + $0x580] sm:$0xff] }
  0xb1   :  { %1191 = vmatmul.mubr.f32.gmra.mrb[70].mxu0 %v67_v7  ;;  %2977 = vmatprep.subr.bf16.mxu0 %v2976_v2  ;;  %v189_v2 = vld [vmem:[%s5001_s0 + $0x578] sm:$0xff]  ;;  %v218_v7 = vld [vmem:[%s5001_s0 + $0x660] sm:$0xff] }
  0xb2   :  { %1336 = vmatmul.mubr.f32.gmra.mrb[70].mxu1 %v69_v8  ;;  %1195 = vmatprep.mubr.f32.mxu0 %v83_v9  ;;  %v220_v8 = vld [vmem:[%s5001_s0 + $0x670] sm:$0xff]  ;;  %v217_v9 = vld [vmem:[%s5001_s0 + $0x658] sm:$0xff] }
  0xb3   :  { %1340 = vmatprep.mubr.f32.mxu1 %v85_v11  ;;  %3015 = vmatpush3.bf16.msra.mxu1 %v2978_v10  ;;  %v233_v11 = vld [vmem:[%s5001_s0 + $0x6d8] sm:$0xff] }
  0xb4   :  { %2979 = vmatpush3.bf16.msra.mxu0 %v2978_v10  ;;  %3008 = vmatprep.subr.bf16.mxu1 %v2980_v12  ;;  %v219_v10 = vld [vmem:[%s5001_s0 + $0x668] sm:$0xff] }
  0xb5   :  { %1196 = vmatmul.mubr.f32.gmra.mrb[72].mxu0 %v82_v17  ;;  %2981 = vmatprep.subr.bf16.mxu0 %v2980_v12  ;;  %v235_v12 = vld [vmem:[%s5001_s0 + $0x6e8] sm:$0xff] }
  0xb6   :  { %1341 = vmatmul.mubr.f32.gmra.mrb[72].mxu1 %v84_v18  ;;  %1200 = vmatprep.mubr.f32.mxu0 %v98_v19  ;;  %v247_v17 = vld [vmem:[%s5001_s0 + $0x748] sm:$0xff]  ;;  %v249_v18 = vld [vmem:[%s5001_s0 + $0x758] sm:$0xff] }
  0xb7   :  { %1345 = vmatprep.mubr.f32.mxu1 %v100_v21  ;;  %3016 = vmatpush3.bf16.msra.mxu1 %v2982_v20  ;;  %v27_v19 = vld [vmem:[%s5001_s0 + $0x68] sm:$0xff]  ;;  %v480_v21 = vld [vmem:[%s5000_s1 + $0x710] sm:$0xff] }
  0xb8   :  { %2983 = vmatpush3.bf16.msra.mxu0 %v2982_v20  ;;  %3009 = vmatprep.subr.bf16.mxu1 %v2984_v22  ;;  %v207_v20 = vld [vmem:[%s5001_s0 + $0x608] sm:$0xff] }
  0xb9   :  { %1201 = vmatmul.mubr.f32.gmra.mrb[74].mxu0 %v97_v27  ;;  %2985 = vmatprep.subr.bf16.mxu0 %v2984_v22  ;;  %v481_v22 = vld [vmem:[%s5000_s1 + $0x718] sm:$0xff] }
  0xba   :  { %1346 = vmatmul.mubr.f32.gmra.mrb[74].mxu1 %v99_v28  ;;  %1205 = vmatprep.mubr.f32.mxu0 %v113_v29  ;;  %v3000_v27 = vpack.c.bf16 %v481_v22, %v480_v21  ;;  %v41_v28 = vld [vmem:[%s5001_s0 + $0xd8] sm:$0xff] }
  0xbb   :  { %1350 = vmatprep.mubr.f32.mxu1 %v115_v31  ;;  %3017 = vmatpush3.bf16.msra.mxu1 %v2986_v30  ;;  %v221_v29 = vld [vmem:[%s5001_s0 + $0x678] sm:$0xff] }
  0xbc   :  { %2987 = vmatpush3.bf16.msra.mxu0 %v2986_v30  ;;  %3010 = vmatprep.subr.bf16.mxu1 %v2988_v32  ;;  %v57_v30 = vld [vmem:[%s5001_s0 + $0x158] sm:$0xff] }
  0xbd   :  { %1206 = vmatmul.mubr.f32.gmra.mrb[76].mxu0 %v112_v37  ;;  %2989 = vmatprep.subr.bf16.mxu0 %v2988_v32  ;;  %v237_v31 = vld [vmem:[%s5001_s0 + $0x6f8] sm:$0xff]  ;;  %v56_v32 = vld [vmem:[%s5001_s0 + $0x150] sm:$0xff]  ;;  %v251_v37 = vld [vmem:[%s5001_s0 + $0x768] sm:$0xff] }
  0xbe   :  { %1351 = vmatmul.mubr.f32.gmra.mrb[76].mxu1 %v114_v38  ;;  %1210 = vmatprep.mubr.f32.mxu0 %v128_v39  ;;  %v87_v38 = vld [vmem:[%s5001_s0 + $0x248] sm:$0xff]  ;;  %v28_v39 = vld [vmem:[%s5001_s0 + $0x70] sm:$0xff]  ;;  %v161_v22 = vld [vmem:[%s5001_s0 + $0x498] sm:$0xff] }
  0xbf   :  { %1355 = vmatprep.mubr.f32.mxu1 %v130_v41  ;;  %3018 = vmatpush3.bf16.msra.mxu1 %v2990_v40  ;;  %v43_v41 = vld [vmem:[%s5001_s0 + $0xe8] sm:$0xff] }
  0xc0   :  { %2991 = vmatpush3.bf16.msra.mxu0 %v2990_v40  ;;  %3011 = vmatprep.subr.bf16.mxu1 %v2992_v42  ;;  %v86_v40 = vld [vmem:[%s5001_s0 + $0x240] sm:$0xff] }
  0xc1   :  { %1211 = vmatmul.mubr.f32.gmra.mrb[78].mxu0 %v127_v47  ;;  %2993 = vmatprep.subr.bf16.mxu0 %v2992_v42  ;;  %v102_v42 = vld [vmem:[%s5001_s0 + $0x2c0] sm:$0xff] }
  0xc2   :  { %1356 = vmatmul.mubr.f32.gmra.mrb[78].mxu1 %v129_v48  ;;  %1215 = vmatprep.mubr.f32.mxu0 %v143_v49  ;;  %v88_v48 = vld [vmem:[%s5001_s0 + $0x250] sm:$0xff] }
  0xc3   :  { %1360 = vmatprep.mubr.f32.mxu1 %v145_v51  ;;  %3019 = vmatpush3.bf16.msra.mxu1 %v2994_v50 }
  0xc4   :  { %2995 = vmatpush3.bf16.msra.mxu0 %v2994_v50  ;;  %2997 = vmatprep.subr.bf16.mxu1 %v4246_v52 }
  0xc5   :  { %1216 = vmatmul.mubr.f32.gmra.mrb[80].mxu0 %v142_v53  ;;  %v116_v53 = vld [vmem:[%s5001_s0 + $0x330] sm:$0xff] }
  0xc6   :  { %1361 = vmatmul.mubr.f32.gmra.mrb[80].mxu1 %v144_v54  ;;  %1220 = vmatprep.mubr.f32.mxu0 %v158_v55  ;;  %v103_v55 = vld [vmem:[%s5001_s0 + $0x2c8] sm:$0xff] }
  0xc7   :  { %1365 = vmatprep.mubr.f32.mxu1 %v160_v56  ;;  %v132_v56 = vld [vmem:[%s5001_s0 + $0x3b0] sm:$0xff] }
  0xc9   :  { %1221 = vmatmul.mubr.f32.gmra.mrb[82].mxu0 %v157_v57 }
  0xca   :  { %1366 = vmatmul.mubr.f32.gmra.mrb[82].mxu1 %v159_v58  ;;  %1225 = vmatprep.mubr.f32.mxu0 %v173_v59  ;;  %v118_v58 = vld [vmem:[%s5001_s0 + $0x340] sm:$0xff] }
  0xcb   :  { %1370 = vmatprep.mubr.f32.mxu1 %v175_v60 }
  0xcd   :  { %1226 = vmatmul.mubr.f32.gmra.mrb[84].mxu0 %v172_v61 }
  0xce   :  { %1371 = vmatmul.mubr.f32.gmra.mrb[84].mxu1 %v174_v62  ;;  %1230 = vmatprep.mubr.f32.mxu0 %v188_v63 }
  0xcf   :  { %1375 = vmatprep.mubr.f32.mxu1 %v190_v0  ;;  %v131_v0 = vld [vmem:[%s5001_s0 + $0x3a8] sm:$0xff] }
  0xd1   :  { %1231 = vmatmul.mubr.f32.gmra.mrb[86].mxu0 %v187_v1 }
  0xd2   :  { %1376 = vmatmul.mubr.f32.gmra.mrb[86].mxu1 %v189_v2  ;;  %1235 = vmatprep.mubr.f32.mxu0 %v203_v3  ;;  %v133_v2 = vld [vmem:[%s5001_s0 + $0x3b8] sm:$0xff]  ;;  %v147_v3 = vld [vmem:[%s5001_s0 + $0x428] sm:$0xff] }
  0xd3   :  { %1380 = vmatprep.mubr.f32.mxu1 %v205_v4 }
  0xd5   :  { %1236 = vmatmul.mubr.f32.gmra.mrb[88].mxu0 %v202_v5  ;;  %v148_v5 = vld [vmem:[%s5001_s0 + $0x430] sm:$0xff] }
  0xd6   :  { %1381 = vmatmul.mubr.f32.gmra.mrb[88].mxu1 %v204_v6  ;;  %1240 = vmatprep.mubr.f32.mxu0 %v218_v7 }
  0xd7   :  { %1385 = vmatprep.mubr.f32.mxu1 %v220_v8 }
  0xd9   :  { %1241 = vmatmul.mubr.f32.gmra.mrb[90].mxu0 %v217_v9 }
  0xda   :  { %1386 = vmatmul.mubr.f32.gmra.mrb[90].mxu1 %v219_v10  ;;  %1245 = vmatprep.mubr.f32.mxu0 %v233_v11  ;;  %v146_v11 = vld [vmem:[%s5001_s0 + $0x420] sm:$0xff] }
  0xdb   :  { %1390 = vmatprep.mubr.f32.mxu1 %v235_v12 }
  0xdd   :  { %1246 = vmatmul.mubr.f32.gmra.mrb[92].mxu0 %v232_v13  ;;  %v163_v13 = vld [vmem:[%s5001_s0 + $0x4a8] sm:$0xff] }
  0xde   :  { %1391 = vmatmul.mubr.f32.gmra.mrb[92].mxu1 %v234_v14  ;;  %1250 = vmatprep.mubr.f32.mxu0 %v248_v15  ;;  %v162_v14 = vld [vmem:[%s5001_s0 + $0x4a0] sm:$0xff] }
  0xdf   :  { %1395 = vmatprep.mubr.f32.mxu1 %v250_v16  ;;  %v178_v16 = vld [vmem:[%s5001_s0 + $0x520] sm:$0xff] }
  0xe1   :  { %1251 = vmatmul.mubr.f32.gmra.mrb[94].mxu0 %v247_v17 }
  0xe2   :  { %1396 = vmatmul.mubr.f32.gmra.mrb[94].mxu1 %v249_v18  ;;  %1465 = vmatprep.mubr.f32.mxu0 %v27_v19 }
  0xe3   :  { %1525 = vmatprep.mubr.f32.mxu1 %v207_v20 }
  0xe5   :  { %1466 = vmatmul.mubr.f32.vlgmr.msra.gmra.mrb[96].mxu0 %v26_v23 }
  0xe6   :  { %1526 = vmatmul.mubr.f32.vlgmr.msra.gmra.mrb[96].mxu1 %v206_v24  ;;  %1470 = vmatprep.mubr.f32.mxu0 %v42_v25  ;;  %v193_v24 = vld [vmem:[%s5001_s0 + $0x598] sm:$0xff] }
  0xe7   :  { %2999 = vmatpush3.bf16.msra.mxu1 %v4246_v52  ;;  %1530 = vmatprep.mubr.f32.mxu1 %v222_v26  ;;  %v177_v25 = vld [vmem:[%s5001_s0 + $0x518] sm:$0xff] }
  0xe8   :  { %3001 = vmatprep.subr.bf16.mxu1 %v3000_v27 }
  0xe9   :  { %1471 = vmatmul.mubr.f32.gmra.mrb[98].mxu0 %v41_v28 }
  0xea   :  { %1531 = vmatmul.mubr.f32.gmra.mrb[98].mxu1 %v221_v29  ;;  %1475 = vmatprep.mubr.f32.mxu0 %v57_v30 }
  0xeb   :  { %1535 = vmatprep.mubr.f32.mxu1 %v237_v31  ;;  %3003 = vmatpush3.bf16.msra.mxu1 %v3000_v27  ;;  %v208_v27 = vld [vmem:[%s5001_s0 + $0x610] sm:$0xff] }
  0xed   :  { %1476 = vmatmul.mubr.f32.gmra.mrb[100].mxu0 %v56_v32 }
  0xee   :  { %1536 = vmatmul.mubr.f32.gmra.mrb[100].mxu1 %v236_v33  ;;  %1480 = vmatprep.mubr.f32.mxu0 %v72_v34  ;;  %v176_v33 = vld [vmem:[%s5001_s0 + $0x510] sm:$0xff] }
  0xef   :  { %1540 = vmatprep.mubr.f32.mxu1 %v252_v35  ;;  %v223_v35 = vld [vmem:[%s5001_s0 + $0x688] sm:$0xff] }
  0xf1   :  { %1481 = vmatmul.mubr.f32.gmra.mrb[102].mxu0 %v71_v36  ;;  %v192_v36 = vld [vmem:[%s5001_s0 + $0x590] sm:$0xff] }
  0xf2   :  { %1541 = vmatmul.mubr.f32.gmra.mrb[102].mxu1 %v251_v37  ;;  %1485 = vmatprep.mubr.f32.mxu0 %v87_v38  ;;  %v238_v38 = vld [vmem:[%s5001_s0 + $0x700] sm:$0xff] }
  0xf3   :  { %2748 = vmatprep.mubr.msk.f32.mxu1 %vm482_vm0, %v28_v39 }
  0xf5   :  { %1486 = vmatmul.mubr.f32.gmra.mrb[104].mxu0 %v86_v40 }
  0xf6   :  { %2749 = vmatmul.mubr.msk.f32.vlgmr.msra.gmra.mrb[104].mxu1 %vm482_vm0, %v43_v41  ;;  %1490 = vmatprep.mubr.f32.mxu0 %v102_v42 }
  0xf7   :  { %2751 = vmatprep.mubr.msk.f32.mxu1 %vm482_vm0, %v58_v43 }
  0xf8   :  { %v2192_v47 = vpop.f32.mrb[0].mxu0 }
  0xf9   :  { %v2272_v49 = vpop.f32.mrb[0].mxu1  ;;  %v2193_v50 = vpop.f32.mrb[1].mxu0  ;;  %1491 = vmatmul.mubr.f32.gmra.mrb[106].mxu0 %v101_v44  ;;  %v191_v44 = vld [vmem:[%s5001_s0 + $0x588] sm:$0xff] }
  0xfa   :  { %v2194_v51 = vadd.f32 %v2193_v50, %v2192_v47  ;;  %v2273_v52 = vpop.f32.mrb[1].mxu1  ;;  %2752 = vmatmul.mubr.msk.f32.gmra.mrb[106].mxu1 %vm482_vm0, %v73_v45  ;;  %1495 = vmatprep.mubr.f32.mxu0 %v117_v46  ;;  %v253_v46 = vld [vmem:[%s5001_s0 + $0x778] sm:$0xff] }
  0xfb   :  { %v2274_v54 = vadd.f32 %v2273_v52, %v2272_v49  ;;  %2754 = vmatprep.mubr.msk.f32.mxu1 %vm482_vm0, %v88_v48 }
  0xfc   :  { %v2195_v57 = vpop.f32.mrb[2].mxu0 }
  0xfd   :  { %v4441_v59 = vadd.f32 %v2274_v54, %v2194_v51  ;;  %v2275_v60 = vpop.f32.mrb[2].mxu1  ;;  %v2196_v61 = vpop.f32.mrb[3].mxu0  ;;  %1496 = vmatmul.mubr.f32.gmra.mrb[108].mxu0 %v116_v53 }
  0xfe   :  { %v2197_v62 = vadd.f32 %v2196_v61, %v2195_v57  ;;  %v2276_v63 = vpop.f32.mrb[3].mxu1  ;;  %2755 = vmatmul.mubr.msk.f32.gmra.mrb[108].mxu1 %vm482_vm0, %v103_v55  ;;  %1500 = vmatprep.mubr.f32.mxu0 %v132_v56 }
  0xff   :  { %v2277_v1 = vadd.f32 %v2276_v63, %v2275_v60  ;;  %2757 = vmatprep.mubr.msk.f32.mxu1 %vm482_vm0, %v118_v58 }
 0x100   :  { %v2198_v4 = vpop.f32.mrb[4].mxu0 }
 0x101   :  { %v4457_v6 = vadd.f32 %v2277_v1, %v2197_v62  ;;  %v2278_v7 = vpop.f32.mrb[4].mxu1  ;;  %v2199_v8 = vpop.f32.mrb[5].mxu0  ;;  %1501 = vmatmul.mubr.f32.gmra.mrb[110].mxu0 %v131_v0 }
 0x102   :  { %v2200_v9 = vadd.f32 %v2199_v8, %v2198_v4  ;;  %v2279_v10 = vpop.f32.mrb[5].mxu1  ;;  %2758 = vmatmul.mubr.msk.f32.gmra.mrb[110].mxu1 %vm482_vm0, %v133_v2  ;;  %1505 = vmatprep.mubr.f32.mxu0 %v147_v3 }
 0x103   :  { %v2280_v12 = vadd.f32 %v2279_v10, %v2278_v7  ;;  %2760 = vmatprep.mubr.msk.f32.mxu1 %vm482_vm0, %v148_v5 }
 0x104   :  { %v2201_v15 = vpop.f32.mrb[6].mxu0 }
 0x105   :  { %v4473_v17 = vadd.f32 %v2280_v12, %v2200_v9  ;;  %v2281_v18 = vpop.f32.mrb[6].mxu1  ;;  %v2202_v19 = vpop.f32.mrb[7].mxu0  ;;  %1506 = vmatmul.mubr.f32.gmra.mrb[112].mxu0 %v146_v11 }
 0x106   :  { %v2203_v20 = vadd.f32 %v2202_v19, %v2201_v15  ;;  %v2282_v21 = vpop.f32.mrb[7].mxu1  ;;  %2761 = vmatmul.mubr.msk.f32.gmra.mrb[112].mxu1 %vm482_vm0, %v163_v13  ;;  %1510 = vmatprep.mubr.f32.mxu0 %v162_v14 }
 0x107   :  { %v2283_v23 = vadd.f32 %v2282_v21, %v2281_v18  ;;  %2763 = vmatprep.mubr.msk.f32.mxu1 %vm482_vm0, %v178_v16 }
 0x108   :  { %v2204_v26 = vpop.f32.mrb[8].mxu0 }
 0x109   :  { %v4489_v28 = vadd.f32 %v2283_v23, %v2203_v20  ;;  %v2284_v29 = vpop.f32.mrb[8].mxu1  ;;  %v2205_v30 = vpop.f32.mrb[9].mxu0  ;;  %1511 = vmatmul.mubr.f32.gmra.mrb[114].mxu0 %v161_v22 }
 0x10a   :  { %v2206_v31 = vadd.f32 %v2205_v30, %v2204_v26  ;;  %v2285_v32 = vpop.f32.mrb[9].mxu1  ;;  %2764 = vmatmul.mubr.msk.f32.gmra.mrb[114].mxu1 %vm482_vm0, %v193_v24  ;;  %1515 = vmatprep.mubr.f32.mxu0 %v177_v25 }
 0x10b   :  { %v2286_v34 = vadd.f32 %v2285_v32, %v2284_v29  ;;  %2766 = vmatprep.mubr.msk.f32.mxu1 %vm482_vm0, %v208_v27 }
 0x10c   :  { %v2207_v37 = vpop.f32.mrb[10].mxu0 }
 0x10d   :  { %v4505_v39 = vadd.f32 %v2286_v34, %v2206_v31  ;;  %v2287_v40 = vpop.f32.mrb[10].mxu1  ;;  %v2208_v41 = vpop.f32.mrb[11].mxu0  ;;  %1516 = vmatmul.mubr.f32.gmra.mrb[116].mxu0 %v176_v33 }
 0x10e   :  { %v2209_v42 = vadd.f32 %v2208_v41, %v2207_v37  ;;  %v2288_v43 = vpop.f32.mrb[11].mxu1  ;;  %2767 = vmatmul.mubr.msk.f32.gmra.mrb[116].mxu1 %vm482_vm0, %v223_v35  ;;  %1520 = vmatprep.mubr.f32.mxu0 %v192_v36 }
 0x10f   :  { %v2289_v45 = vadd.f32 %v2288_v43, %v2287_v40  ;;  %2769 = vmatprep.mubr.msk.f32.mxu1 %vm482_vm0, %v238_v38 }
 0x110   :  { %v2210_v47 = vpop.f32.mrb[12].mxu0 }
 0x111   :  { %v4515_v48 = vadd.f32 %v2289_v45, %v2209_v42  ;;  %v2290_v49 = vpop.f32.mrb[12].mxu1  ;;  %v2211_v50 = vpop.f32.mrb[13].mxu0  ;;  %1521 = vmatmul.mubr.f32.gmra.mrb[118].mxu0 %v191_v44 }
 0x112   :  { %v2212_v51 = vadd.f32 %v2211_v50, %v2210_v47  ;;  %v2291_v52 = vpop.f32.mrb[13].mxu1  ;;  %2770 = vmatmul.mubr.msk.f32.gmra.mrb[118].mxu1 %vm482_vm0, %v253_v46 }
 0x113   :  { %v2292_v53 = vadd.f32 %v2291_v52, %v2290_v49 }
 0x114   :  { %v2213_v54 = vpop.f32.mrb[14].mxu0 }
 0x115   :  { %v4518_v55 = vadd.f32 %v2292_v53, %v2212_v51  ;;  %v2293_v56 = vpop.f32.mrb[14].mxu1  ;;  %v2214_v57 = vpop.f32.mrb[15].mxu0 }
 0x116   :  { %v2215_v58 = vadd.f32 %v2214_v57, %v2213_v54  ;;  %v2294_v60 = vpop.f32.mrb[15].mxu1 }
 0x117   :  { %v2295_v61 = vadd.f32 %v2294_v60, %v2293_v56 }
 0x118   :  { %v2216_v62 = vpop.f32.mrb[16].mxu0 }
 0x119   :  { %v4520_v63 = vadd.f32 %v2295_v61, %v2215_v58  ;;  %v2296_v0 = vpop.f32.mrb[16].mxu1  ;;  %v2217_v1 = vpop.f32.mrb[17].mxu0 }
 0x11a   :  { %v2218_v2 = vadd.f32 %v2217_v1, %v2216_v62  ;;  %v2297_v3 = vpop.f32.mrb[17].mxu1 }
 0x11b   :  { %v2298_v4 = vadd.f32 %v2297_v3, %v2296_v0 }
 0x11c   :  { %v2219_v5 = vpop.f32.mrb[18].mxu0 }
 0x11d   :  { %v4522_v7 = vadd.f32 %v2298_v4, %v2218_v2  ;;  %v2299_v8 = vpop.f32.mrb[18].mxu1  ;;  %v2220_v9 = vpop.f32.mrb[19].mxu0 }
 0x11e   :  { %v2221_v10 = vadd.f32 %v2220_v9, %v2219_v5  ;;  %v2300_v11 = vpop.f32.mrb[19].mxu1 }
 0x11f   :  { %v2301_v12 = vadd.f32 %v2300_v11, %v2299_v8 }
 0x120   :  { %v2222_v13 = vpop.f32.mrb[20].mxu0 }
 0x121   :  { %v4524_v14 = vadd.f32 %v2301_v12, %v2221_v10  ;;  %v2302_v15 = vpop.f32.mrb[20].mxu1  ;;  %v2223_v16 = vpop.f32.mrb[21].mxu0 }
 0x122   :  { %v2224_v18 = vadd.f32 %v2223_v16, %v2222_v13  ;;  %v2303_v19 = vpop.f32.mrb[21].mxu1 }
 0x123   :  { %v2304_v20 = vadd.f32 %v2303_v19, %v2302_v15 }
 0x124   :  { %v2225_v21 = vpop.f32.mrb[22].mxu0 }
 0x125   :  { %v4526_v22 = vadd.f32 %v2304_v20, %v2224_v18  ;;  %v2305_v23 = vpop.f32.mrb[22].mxu1  ;;  %v2226_v24 = vpop.f32.mrb[23].mxu0 }
 0x126   :  { %v2227_v25 = vadd.f32 %v2226_v24, %v2225_v21  ;;  %v2306_v26 = vpop.f32.mrb[23].mxu1 }
 0x127   :  { %v2307_v27 = vadd.f32 %v2306_v26, %v2305_v23 }
 0x128   :  { %v2228_v29 = vpop.f32.mrb[24].mxu0 }
 0x129   :  { %v4528_v30 = vadd.f32 %v2307_v27, %v2227_v25  ;;  %v2308_v31 = vpop.f32.mrb[24].mxu1  ;;  %v2229_v32 = vpop.f32.mrb[25].mxu0 }
 0x12a   :  { %v2230_v33 = vadd.f32 %v2229_v32, %v2228_v29  ;;  %v2309_v34 = vpop.f32.mrb[25].mxu1 }
 0x12b   :  { %v2310_v35 = vadd.f32 %v2309_v34, %v2308_v31 }
 0x12c   :  { %v2231_v36 = vpop.f32.mrb[26].mxu0 }
 0x12d   :  { %v4530_v37 = vadd.f32 %v2310_v35, %v2230_v33  ;;  %v2311_v38 = vpop.f32.mrb[26].mxu1  ;;  %v2232_v40 = vpop.f32.mrb[27].mxu0 }
 0x12e   :  { %v2233_v41 = vadd.f32 %v2232_v40, %v2231_v36  ;;  %v2312_v42 = vpop.f32.mrb[27].mxu1 }
 0x12f   :  { %v2313_v43 = vadd.f32 %v2312_v42, %v2311_v38 }
 0x130   :  { %v2234_v44 = vpop.f32.mrb[28].mxu0 }
 0x131   :  { %v4532_v45 = vadd.f32 %v2313_v43, %v2233_v41  ;;  %v2314_v46 = vpop.f32.mrb[28].mxu1  ;;  %v2235_v47 = vpop.f32.mrb[29].mxu0 }
 0x132   :  { %v2236_v49 = vadd.f32 %v2235_v47, %v2234_v44  ;;  %v2315_v50 = vpop.f32.mrb[29].mxu1 }
 0x133   :  { %v2316_v51 = vadd.f32 %v2315_v50, %v2314_v46 }
 0x134   :  { %v2237_v52 = vpop.f32.mrb[30].mxu0 }
 0x135   :  { %v4534_v53 = vadd.f32 %v2316_v51, %v2236_v49  ;;  %v2317_v54 = vpop.f32.mrb[30].mxu1  ;;  %v2238_v56 = vpop.f32.mrb[31].mxu0 }
 0x136   :  { %v2239_v57 = vadd.f32 %v2238_v56, %v2237_v52  ;;  %v2318_v58 = vpop.f32.mrb[31].mxu1 }
 0x137   :  { %v2319_v60 = vadd.f32 %v2318_v58, %v2317_v54 }
 0x138   :  { %v2352_v61 = vpop.f32.mrb[32].mxu0 }
 0x139   :  { %v4536_v62 = vadd.f32 %v2319_v60, %v2239_v57  ;;  %v2432_v0 = vpop.f32.mrb[32].mxu1  ;;  %v2353_v1 = vpop.f32.mrb[33].mxu0 }
 0x13a   :  { %v2354_v2 = vadd.f32 %v2353_v1, %v2352_v61  ;;  %v2433_v3 = vpop.f32.mrb[33].mxu1 }
 0x13b   :  { %v2434_v4 = vadd.f32 %v2433_v3, %v2432_v0 }
 0x13c   :  { %v888_v5 = vadd.f32 %v2354_v2, %v4441_v59  ;;  %v2355_v8 = vpop.f32.mrb[34].mxu0 }
 0x13d   :  { %v2435_v9 = vpop.f32.mrb[34].mxu1  ;;  %v2356_v10 = vpop.f32.mrb[35].mxu0 }
 0x13e   :  { %v4539_v11 = vadd.f32 %v2434_v4, %v888_v5  ;;  %v2357_v12 = vadd.f32 %v2356_v10, %v2355_v8  ;;  %v2436_v13 = vpop.f32.mrb[35].mxu1 }
 0x13f   :  { %v2437_v15 = vadd.f32 %v2436_v13, %v2435_v9 }
 0x140   :  { %v893_v16 = vadd.f32 %v2357_v12, %v4457_v6  ;;  %v2358_v18 = vpop.f32.mrb[36].mxu0 }
 0x141   :  { %v2438_v19 = vpop.f32.mrb[36].mxu1  ;;  %v2359_v20 = vpop.f32.mrb[37].mxu0 }
 0x142   :  { %v4542_v21 = vadd.f32 %v2437_v15, %v893_v16  ;;  %v2360_v23 = vadd.f32 %v2359_v20, %v2358_v18  ;;  %v2439_v24 = vpop.f32.mrb[37].mxu1 }
 0x143   :  { %v2440_v25 = vadd.f32 %v2439_v24, %v2438_v19 }
 0x144   :  { %v898_v59 = vadd.f32 %v2360_v23, %v4473_v17  ;;  %v2361_v26 = vpop.f32.mrb[38].mxu0 }
 0x145   :  { %v2441_v27 = vpop.f32.mrb[38].mxu1  ;;  %v2362_v29 = vpop.f32.mrb[39].mxu0 }
 0x146   :  { %v4545_v31 = vadd.f32 %v2440_v25, %v898_v59  ;;  %v2363_v32 = vadd.f32 %v2362_v29, %v2361_v26  ;;  %v2442_v33 = vpop.f32.mrb[39].mxu1 }
 0x147   :  { %v2443_v34 = vadd.f32 %v2442_v33, %v2441_v27 }
 0x148   :  { %v903_v6 = vadd.f32 %v2363_v32, %v4489_v28  ;;  %v2364_v35 = vpop.f32.mrb[40].mxu0 }
 0x149   :  { %v2444_v36 = vpop.f32.mrb[40].mxu1  ;;  %v2365_v38 = vpop.f32.mrb[41].mxu0 }
 0x14a   :  { %v4548_v40 = vadd.f32 %v2443_v34, %v903_v6  ;;  %v2366_v41 = vadd.f32 %v2365_v38, %v2364_v35  ;;  %v2445_v42 = vpop.f32.mrb[41].mxu1 }
 0x14b   :  { %v2446_v43 = vadd.f32 %v2445_v42, %v2444_v36 }
 0x14c   :  { %v908_v17 = vadd.f32 %v2366_v41, %v4505_v39  ;;  %v2367_v44 = vpop.f32.mrb[42].mxu0 }
 0x14d   :  { %v2447_v46 = vpop.f32.mrb[42].mxu1  ;;  %v2368_v47 = vpop.f32.mrb[43].mxu0 }
 0x14e   :  { %v4551_v49 = vadd.f32 %v2446_v43, %v908_v17  ;;  %v2369_v50 = vadd.f32 %v2368_v47, %v2367_v44  ;;  %v2448_v51 = vpop.f32.mrb[43].mxu1 }
 0x14f   :  { %v2449_v52 = vadd.f32 %v2448_v51, %v2447_v46 }
 0x150   :  { %v913_v28 = vadd.f32 %v2369_v50, %v4515_v48  ;;  %v2370_v54 = vpop.f32.mrb[44].mxu0 }
 0x151   :  { %v2450_v56 = vpop.f32.mrb[44].mxu1  ;;  %v2371_v57 = vpop.f32.mrb[45].mxu0 }
 0x152   :  { %v4554_v58 = vadd.f32 %v2449_v52, %v913_v28  ;;  %v2372_v60 = vadd.f32 %v2371_v57, %v2370_v54  ;;  %v2451_v61 = vpop.f32.mrb[45].mxu1 }
 0x153   :  { %v2452_v0 = vadd.f32 %v2451_v61, %v2450_v56 }
 0x154   :  { %v918_v39 = vadd.f32 %v2372_v60, %v4518_v55  ;;  %v2373_v1 = vpop.f32.mrb[46].mxu0 }
 0x155   :  { %v2453_v2 = vpop.f32.mrb[46].mxu1  ;;  %v2374_v3 = vpop.f32.mrb[47].mxu0 }
 0x156   :  { %v4557_v4 = vadd.f32 %v2452_v0, %v918_v39  ;;  %v2375_v5 = vadd.f32 %v2374_v3, %v2373_v1  ;;  %v2454_v8 = vpop.f32.mrb[47].mxu1 }
 0x157   :  { %v2455_v9 = vadd.f32 %v2454_v8, %v2453_v2 }
 0x158   :  { %v923_v48 = vadd.f32 %v2375_v5, %v4520_v63  ;;  %v2376_v10 = vpop.f32.mrb[48].mxu0 }
 0x159   :  { %v2456_v12 = vpop.f32.mrb[48].mxu1  ;;  %v2377_v13 = vpop.f32.mrb[49].mxu0 }
 0x15a   :  { %v4560_v15 = vadd.f32 %v2455_v9, %v923_v48  ;;  %v2378_v16 = vadd.f32 %v2377_v13, %v2376_v10  ;;  %v2457_v18 = vpop.f32.mrb[49].mxu1 }
 0x15b   :  { %v2458_v19 = vadd.f32 %v2457_v18, %v2456_v12 }
 0x15c   :  { %v928_v55 = vadd.f32 %v2378_v16, %v4522_v7  ;;  %v2379_v20 = vpop.f32.mrb[50].mxu0 }
 0x15d   :  { %v2459_v23 = vpop.f32.mrb[50].mxu1  ;;  %v2380_v24 = vpop.f32.mrb[51].mxu0 }
 0x15e   :  { %v4563_v25 = vadd.f32 %v2458_v19, %v928_v55  ;;  %v2381_v59 = vadd.f32 %v2380_v24, %v2379_v20  ;;  %v2460_v26 = vpop.f32.mrb[51].mxu1 }
 0x15f   :  { %v2461_v27 = vadd.f32 %v2460_v26, %v2459_v23 }
 0x160   :  { %v933_v63 = vadd.f32 %v2381_v59, %v4524_v14  ;;  %v2382_v29 = vpop.f32.mrb[52].mxu0 }
 0x161   :  { %v2462_v32 = vpop.f32.mrb[52].mxu1  ;;  %v2383_v33 = vpop.f32.mrb[53].mxu0 }
 0x162   :  { %v4566_v34 = vadd.f32 %v2461_v27, %v933_v63  ;;  %v2384_v6 = vadd.f32 %v2383_v33, %v2382_v29  ;;  %v2463_v35 = vpop.f32.mrb[53].mxu1 }
 0x163   :  { %v2464_v36 = vadd.f32 %v2463_v35, %v2462_v32 }
 0x164   :  { %v938_v7 = vadd.f32 %v2384_v6, %v4526_v22  ;;  %v2385_v38 = vpop.f32.mrb[54].mxu0 }
 0x165   :  { %v2465_v41 = vpop.f32.mrb[54].mxu1  ;;  %v2386_v42 = vpop.f32.mrb[55].mxu0 }
 0x166   :  { %v4569_v43 = vadd.f32 %v2464_v36, %v938_v7  ;;  %v2387_v17 = vadd.f32 %v2386_v42, %v2385_v38  ;;  %v2466_v44 = vpop.f32.mrb[55].mxu1 }
 0x167   :  { %v2467_v46 = vadd.f32 %v2466_v44, %v2465_v41 }
 0x168   :  { %v943_v14 = vadd.f32 %v2387_v17, %v4528_v30  ;;  %v2388_v47 = vpop.f32.mrb[56].mxu0 }
 0x169   :  { %v2468_v50 = vpop.f32.mrb[56].mxu1  ;;  %v2389_v51 = vpop.f32.mrb[57].mxu0 }
 0x16a   :  { %v4572_v52 = vadd.f32 %v2467_v46, %v943_v14  ;;  %v2390_v28 = vadd.f32 %v2389_v51, %v2388_v47  ;;  %v2469_v54 = vpop.f32.mrb[57].mxu1 }
 0x16b   :  { %v2470_v56 = vadd.f32 %v2469_v54, %v2468_v50 }
 0x16c   :  { %v948_v22 = vadd.f32 %v2390_v28, %v4530_v37  ;;  %v2391_v57 = vpop.f32.mrb[58].mxu0 }
 0x16d   :  { %v2471_v60 = vpop.f32.mrb[58].mxu1  ;;  %v2392_v61 = vpop.f32.mrb[59].mxu0 }
 0x16e   :  { %v4575_v0 = vadd.f32 %v2470_v56, %v948_v22  ;;  %v2393_v39 = vadd.f32 %v2392_v61, %v2391_v57  ;;  %v2472_v1 = vpop.f32.mrb[59].mxu1 }
 0x16f   :  { %v2473_v2 = vadd.f32 %v2472_v1, %v2471_v60 }
 0x170   :  { %v953_v30 = vadd.f32 %v2393_v39, %v4532_v45  ;;  %v2394_v3 = vpop.f32.mrb[60].mxu0 }
 0x171   :  { %v2474_v5 = vpop.f32.mrb[60].mxu1  ;;  %v2395_v8 = vpop.f32.mrb[61].mxu0 }
 0x172   :  { %v4578_v9 = vadd.f32 %v2473_v2, %v953_v30  ;;  %v2396_v48 = vadd.f32 %v2395_v8, %v2394_v3  ;;  %v2475_v10 = vpop.f32.mrb[61].mxu1 }
 0x173   :  { %v2476_v12 = vadd.f32 %v2475_v10, %v2474_v5 }
 0x174   :  { %v958_v37 = vadd.f32 %v2396_v48, %v4534_v53  ;;  %v2397_v13 = vpop.f32.mrb[62].mxu0 }
 0x175   :  { %v2477_v16 = vpop.f32.mrb[62].mxu1  ;;  %v2398_v18 = vpop.f32.mrb[63].mxu0 }
 0x176   :  { %v4581_v19 = vadd.f32 %v2476_v12, %v958_v37  ;;  %v2399_v55 = vadd.f32 %v2398_v18, %v2397_v13  ;;  %v2478_v20 = vpop.f32.mrb[63].mxu1 }
 0x177   :  { %v2479_v23 = vadd.f32 %v2478_v20, %v2477_v16 }
 0x178   :  { %v963_v45 = vadd.f32 %v2399_v55, %v4536_v62  ;;  %v2512_v24 = vpop.f32.mrb[64].mxu0 }
 0x179   :  { %v2592_v59 = vpop.f32.mrb[64].mxu1  ;;  %v2513_v26 = vpop.f32.mrb[65].mxu0 }
 0x17a   :  { %v4584_v27 = vadd.f32 %v2479_v23, %v963_v45  ;;  %v2514_v63 = vadd.f32 %v2513_v26, %v2512_v24  ;;  %v2593_v29 = vpop.f32.mrb[65].mxu1 }
 0x17b   :  { %v2594_v32 = vadd.f32 %v2593_v29, %v2592_v59 }
 0x17c   :  { %v1178_v53 = vadd.f32 %v2514_v63, %v4539_v11  ;;  %v2515_v33 = vpop.f32.mrb[66].mxu0 }
 0x17d   :  { %v2595_v6 = vpop.f32.mrb[66].mxu1  ;;  %v2516_v35 = vpop.f32.mrb[67].mxu0 }
 0x17e   :  { %v4587_v36 = vadd.f32 %v2594_v32, %v1178_v53  ;;  %v2517_v7 = vadd.f32 %v2516_v35, %v2515_v33  ;;  %v2596_v38 = vpop.f32.mrb[67].mxu1 }
 0x17f   :  { %v2597_v41 = vadd.f32 %v2596_v38, %v2595_v6 }
 0x180   :  { %v1183_v62 = vadd.f32 %v2517_v7, %v4542_v21  ;;  %v2518_v42 = vpop.f32.mrb[68].mxu0 }
 0x181   :  { %v2598_v17 = vpop.f32.mrb[68].mxu1  ;;  %v2519_v44 = vpop.f32.mrb[69].mxu0 }
 0x182   :  { %v4590_v46 = vadd.f32 %v2597_v41, %v1183_v62  ;;  %v2520_v14 = vadd.f32 %v2519_v44, %v2518_v42  ;;  %v2599_v47 = vpop.f32.mrb[69].mxu1 }
 0x183   :  { %v2600_v50 = vadd.f32 %v2599_v47, %v2598_v17 }
 0x184   :  { %v1188_v11 = vadd.f32 %v2520_v14, %v4545_v31  ;;  %v2521_v51 = vpop.f32.mrb[70].mxu0 }
 0x185   :  { %v2601_v28 = vpop.f32.mrb[70].mxu1  ;;  %v2522_v54 = vpop.f32.mrb[71].mxu0 }
 0x186   :  { %v4593_v56 = vadd.f32 %v2600_v50, %v1188_v11  ;;  %v2523_v22 = vadd.f32 %v2522_v54, %v2521_v51  ;;  %v2602_v57 = vpop.f32.mrb[71].mxu1 }
 0x187   :  { %v2603_v60 = vadd.f32 %v2602_v57, %v2601_v28 }
 0x188   :  { %v1193_v21 = vadd.f32 %v2523_v22, %v4548_v40  ;;  %v2524_v61 = vpop.f32.mrb[72].mxu0 }
 0x189   :  { %v2604_v39 = vpop.f32.mrb[72].mxu1  ;;  %v2525_v1 = vpop.f32.mrb[73].mxu0 }
 0x18a   :  { %v4596_v2 = vadd.f32 %v2603_v60, %v1193_v21  ;;  %v2526_v30 = vadd.f32 %v2525_v1, %v2524_v61  ;;  %v2605_v3 = vpop.f32.mrb[73].mxu1 }
 0x18b   :  { %v2606_v5 = vadd.f32 %v2605_v3, %v2604_v39 }
 0x18c   :  { %v1198_v31 = vadd.f32 %v2526_v30, %v4551_v49  ;;  %v2527_v8 = vpop.f32.mrb[74].mxu0 }
 0x18d   :  { %v2607_v48 = vpop.f32.mrb[74].mxu1  ;;  %v2528_v10 = vpop.f32.mrb[75].mxu0 }
 0x18e   :  { %v4599_v12 = vadd.f32 %v2606_v5, %v1198_v31  ;;  %v2529_v37 = vadd.f32 %v2528_v10, %v2527_v8  ;;  %v2608_v13 = vpop.f32.mrb[75].mxu1 }
 0x18f   :  { %v2609_v16 = vadd.f32 %v2608_v13, %v2607_v48 }
 0x190   :  { %v1203_v40 = vadd.f32 %v2529_v37, %v4554_v58  ;;  %v2530_v18 = vpop.f32.mrb[76].mxu0 }
 0x191   :  { %v2610_v55 = vpop.f32.mrb[76].mxu1  ;;  %v2531_v20 = vpop.f32.mrb[77].mxu0 }
 0x192   :  { %v4602_v23 = vadd.f32 %v2609_v16, %v1203_v40  ;;  %v2532_v45 = vadd.f32 %v2531_v20, %v2530_v18  ;;  %v2611_v24 = vpop.f32.mrb[77].mxu1 }
 0x193   :  { %v2612_v59 = vadd.f32 %v2611_v24, %v2610_v55 }
 0x194   :  { %v1208_v49 = vadd.f32 %v2532_v45, %v4557_v4  ;;  %v2533_v26 = vpop.f32.mrb[78].mxu0 }
 0x195   :  { %v2613_v63 = vpop.f32.mrb[78].mxu1  ;;  %v2534_v29 = vpop.f32.mrb[79].mxu0 }
 0x196   :  { %v4605_v32 = vadd.f32 %v2612_v59, %v1208_v49  ;;  %v2535_v53 = vadd.f32 %v2534_v29, %v2533_v26  ;;  %v2614_v33 = vpop.f32.mrb[79].mxu1 }
 0x197   :  { %v2615_v6 = vadd.f32 %v2614_v33, %v2613_v63 }
 0x198   :  { %v1213_v58 = vadd.f32 %v2535_v53, %v4560_v15  ;;  %v2536_v35 = vpop.f32.mrb[80].mxu0 }
 0x199   :  { %v2616_v7 = vpop.f32.mrb[80].mxu1  ;;  %v2537_v38 = vpop.f32.mrb[81].mxu0 }
 0x19a   :  { %v4608_v41 = vadd.f32 %v2615_v6, %v1213_v58  ;;  %v2538_v62 = vadd.f32 %v2537_v38, %v2536_v35  ;;  %v2617_v42 = vpop.f32.mrb[81].mxu1 }
 0x19b   :  { %v2618_v17 = vadd.f32 %v2617_v42, %v2616_v7 }
 0x19c   :  { %v1218_v4 = vadd.f32 %v2538_v62, %v4563_v25  ;;  %v2539_v44 = vpop.f32.mrb[82].mxu0 }
 0x19d   :  { %v2619_v14 = vpop.f32.mrb[82].mxu1  ;;  %v2540_v47 = vpop.f32.mrb[83].mxu0 }
 0x19e   :  { %v4611_v50 = vadd.f32 %v2618_v17, %v1218_v4  ;;  %v2541_v11 = vadd.f32 %v2540_v47, %v2539_v44  ;;  %v2620_v51 = vpop.f32.mrb[83].mxu1 }
 0x19f   :  { %v2621_v28 = vadd.f32 %v2620_v51, %v2619_v14 }
 0x1a0   :  { %v1223_v15 = vadd.f32 %v2541_v11, %v4566_v34  ;;  %v2542_v54 = vpop.f32.mrb[84].mxu0 }
 0x1a1   :  { %v2622_v22 = vpop.f32.mrb[84].mxu1  ;;  %v2543_v57 = vpop.f32.mrb[85].mxu0 }
 0x1a2   :  { %v4614_v60 = vadd.f32 %v2621_v28, %v1223_v15  ;;  %v2544_v21 = vadd.f32 %v2543_v57, %v2542_v54  ;;  %v2623_v61 = vpop.f32.mrb[85].mxu1 }
 0x1a3   :  { %v2624_v39 = vadd.f32 %v2623_v61, %v2622_v22 }
 0x1a4   :  { %v1228_v25 = vadd.f32 %v2544_v21, %v4569_v43  ;;  %v2545_v1 = vpop.f32.mrb[86].mxu0 }
 0x1a5   :  { %v2625_v30 = vpop.f32.mrb[86].mxu1  ;;  %v2546_v3 = vpop.f32.mrb[87].mxu0 }
 0x1a6   :  { %v4617_v5 = vadd.f32 %v2624_v39, %v1228_v25  ;;  %v2547_v31 = vadd.f32 %v2546_v3, %v2545_v1  ;;  %v2626_v8 = vpop.f32.mrb[87].mxu1 }
 0x1a7   :  { %v2627_v48 = vadd.f32 %v2626_v8, %v2625_v30 }
 0x1a8   :  { %v1233_v34 = vadd.f32 %v2547_v31, %v4572_v52  ;;  %v2548_v10 = vpop.f32.mrb[88].mxu0 }
 0x1a9   :  { %v2628_v37 = vpop.f32.mrb[88].mxu1  ;;  %v2549_v13 = vpop.f32.mrb[89].mxu0 }
 0x1aa   :  { %v4620_v16 = vadd.f32 %v2627_v48, %v1233_v34  ;;  %v2550_v40 = vadd.f32 %v2549_v13, %v2548_v10  ;;  %v2629_v18 = vpop.f32.mrb[89].mxu1 }
 0x1ab   :  { %v2630_v55 = vadd.f32 %v2629_v18, %v2628_v37 }
 0x1ac   :  { %v1238_v43 = vadd.f32 %v2550_v40, %v4575_v0  ;;  %v2551_v20 = vpop.f32.mrb[90].mxu0 }
 0x1ad   :  { %v2631_v45 = vpop.f32.mrb[90].mxu1  ;;  %v2552_v24 = vpop.f32.mrb[91].mxu0 }
 0x1ae   :  { %v1383_v59 = vadd.f32 %v2630_v55, %v1238_v43  ;;  %v2553_v49 = vadd.f32 %v2552_v24, %v2551_v20  ;;  %v2632_v26 = vpop.f32.mrb[91].mxu1 }
 0x1af   :  { %v2633_v63 = vadd.f32 %v2632_v26, %v2631_v45 }
 0x1b0   :  { %v1243_v29 = vadd.f32 %v2553_v49, %v4578_v9  ;;  %v2554_v52 = vpop.f32.mrb[92].mxu0 }
 0x1b1   :  { %v2634_v53 = vpop.f32.mrb[92].mxu1  ;;  %v2555_v33 = vpop.f32.mrb[93].mxu0 }
 0x1b2   :  { %v1388_v6 = vadd.f32 %v2633_v63, %v1243_v29  ;;  %v2556_v58 = vadd.f32 %v2555_v33, %v2554_v52  ;;  %v2635_v35 = vpop.f32.mrb[93].mxu1 }
 0x1b3   :  { %v2636_v7 = vadd.f32 %v2635_v35, %v2634_v53 }
 0x1b4   :  { %v1248_v38 = vadd.f32 %v2556_v58, %v4581_v19  ;;  %v2557_v62 = vpop.f32.mrb[94].mxu0 }
 0x1b5   :  { %v2637_v0 = vpop.f32.mrb[94].mxu1  ;;  %v2558_v42 = vpop.f32.mrb[95].mxu0 }
 0x1b6   :  { %v1393_v17 = vadd.f32 %v2636_v7, %v1248_v38  ;;  %v2559_v4 = vadd.f32 %v2558_v42, %v2557_v62  ;;  %v2638_v44 = vpop.f32.mrb[95].mxu1 }
 0x1b7   :  { %v2639_v14 = vadd.f32 %v2638_v44, %v2637_v0 }
 0x1b8   :  { %v1253_v47 = vadd.f32 %v2559_v4, %v4584_v27  ;;  %v2672_v11 = vpop.f32.mrb[96].mxu0 }
 0x1b9   :  { %v2708_v9 = vpop.f32.mrb[96].mxu1  ;;  %v2673_v51 = vpop.f32.mrb[97].mxu0 }
 0x1ba   :  { %v1398_v28 = vadd.f32 %v2639_v14, %v1253_v47  ;;  %v2674_v15 = vadd.f32 %v2673_v51, %v2672_v11  ;;  %v2709_v54 = vpop.f32.mrb[97].mxu1 }
 0x1bb   :  { %v2710_v22 = vadd.f32 %v2709_v54, %v2708_v9 }
 0x1bc   :  { %v2675_v57 = vpop.f32.mrb[98].mxu0  ;;  %v1468_v21 = vadd.f32 %v2674_v15, %v4587_v36 }
 0x1bd   :  { %v2711_v19 = vpop.f32.mrb[98].mxu1  ;;  %v2676_v61 = vpop.f32.mrb[99].mxu0  ;;  %v4627_v39 = vadd.f32 %v2710_v22, %v1383_v59 }
 0x1be   :  { %v2677_v25 = vadd.f32 %v2676_v61, %v2675_v57  ;;  %v2712_v1 = vpop.f32.mrb[99].mxu1 }
 0x1bf   :  { %v2713_v30 = vadd.f32 %v2712_v1, %v2711_v19 }
 0x1c0   :  { %v2678_v3 = vpop.f32.mrb[100].mxu0  ;;  %v1473_v27 = vadd.f32 %v2677_v25, %v4590_v46 }
 0x1c1   :  { %v2714_v31 = vpop.f32.mrb[100].mxu1  ;;  %v2679_v8 = vpop.f32.mrb[101].mxu0  ;;  %v4630_v48 = vadd.f32 %v2713_v30, %v1388_v6 }
 0x1c2   :  { %v2680_v34 = vadd.f32 %v2679_v8, %v2678_v3  ;;  %v2715_v10 = vpop.f32.mrb[101].mxu1 }
 0x1c3   :  { %v2716_v37 = vadd.f32 %v2715_v10, %v2714_v31 }
 0x1c4   :  { %v2681_v13 = vpop.f32.mrb[102].mxu0  ;;  %v1478_v36 = vadd.f32 %v2680_v34, %v4593_v56 }
 0x1c5   :  { %v2717_v40 = vpop.f32.mrb[102].mxu1  ;;  %v2682_v18 = vpop.f32.mrb[103].mxu0  ;;  %v4633_v55 = vadd.f32 %v2716_v37, %v1393_v17 }
 0x1c6   :  { %v2683_v43 = vadd.f32 %v2682_v18, %v2681_v13  ;;  %v2718_v20 = vpop.f32.mrb[103].mxu1 }
 0x1c7   :  { %v2719_v45 = vadd.f32 %v2718_v20, %v2717_v40 }
 0x1c8   :  { %v2684_v24 = vpop.f32.mrb[104].mxu0  ;;  %v1483_v46 = vadd.f32 %v2683_v43, %v4596_v2 }
 0x1c9   :  { %v2750_v59 = vpop.f32.mrb[104].mxu1  ;;  %v2685_v49 = vpop.f32.mrb[105].mxu0  ;;  %v4636_v26 = vadd.f32 %v2719_v45, %v1398_v28 }
 0x1ca   :  { %v4638_v63 = vadd.f32 %v2750_v59, %v1473_v27  ;;  %v2686_v29 = vadd.f32 %v2685_v49, %v2684_v24  ;;  %v1612_v52 = vpop.f32.mrb[105].mxu1 }
 0x1cb   :  { %v4640_v56 = vadd.f32 %v1612_v52, %v1468_v21 }
 0x1cc   :  { %v2687_v53 = vpop.f32.mrb[106].mxu0  ;;  %v1695_v33 = vsel %vm1691_vm1, %v4638_v63, 0.0  ;;  %v1488_v6 = vadd.f32 %v2686_v29, %v4599_v12 }
 0x1cd   :  { %v2753_v58 = vpop.f32.mrb[106].mxu1  ;;  %1696 = vadd.xlane.f32.xlu0 %v1695_v33  ;;  %v2688_v2 = vpop.f32.mrb[107].mxu0  ;;  %v1692_v4 = vsel %vm1691_vm1, %v4640_v56, 0.0 }
 0x1ce   :  { %v4645_v35 = vadd.f32 %v2753_v58, %v1483_v46  ;;  %v2689_v7 = vadd.f32 %v2688_v2, %v2687_v53  ;;  %v1622_v38 = vpop.f32.mrb[107].mxu1 }
 0x1cf   :  { %v4647_v62 = vadd.f32 %v1622_v38, %v1478_v36 }
 0x1d0   :  { %v2690_v0 = vpop.f32.mrb[108].mxu0  ;;  %v1493_v42 = vadd.f32 %v2689_v7, %v4602_v23  ;;  %v1701_v17 = vsel %vm1691_vm1, %v4645_v35, 0.0 }
 0x1d1   :  { %v2756_v44 = vpop.f32.mrb[108].mxu1  ;;  %1702 = vadd.xlane.f32.xlu1 %v1701_v17  ;;  %1693 = vadd.xlane.f32.xlu0 %v1692_v4  ;;  %v2691_v12 = vpop.f32.mrb[109].mxu0  ;;  %v1698_v23 = vsel %vm1691_vm1, %v4647_v62, 0.0 }
 0x1d2   :  { %v4654_v14 = vadd.f32 %v2756_v44, %v1493_v42  ;;  %v2692_v47 = vadd.f32 %v2691_v12, %v2690_v0  ;;  %v1632_v11 = vpop.f32.mrb[109].mxu1  ;;  %v3060_v44 = vmov 1  }
 0x1d3   :  { %v4656_v9 = vadd.f32 %v1632_v11, %v1488_v6  ;;  %3022 = vset.pattern.permute.xlu1 %v3060_v44  ;;  %3023 = vset.pattern.permute.xlu0 %v3060_v44 }
 0x1d4   :  { %v2693_v51 = vpop.f32.mrb[110].mxu0  ;;  %v1498_v28 = vadd.f32 %v2692_v47, %v4605_v32  ;;  %v1707_v1 = vsel %vm1691_vm1, %v4654_v14, 0.0 }
 0x1d5   :  { %v2759_v15 = vpop.f32.mrb[110].mxu1  ;;  %1699 = vadd.xlane.f32.xlu1 %v1698_v23  ;;  %v2694_v54 = vpop.f32.mrb[111].mxu0  ;;  %v1704_v22 = vsel %vm1691_vm1, %v4656_v9, 0.0 }
 0x1d6   :  { %v2695_v57 = vadd.f32 %v2694_v54, %v2693_v51  ;;  %v1642_v21 = vpop.f32.mrb[111].mxu1  ;;  %1705 = vadd.xlane.f32.xlu0 %v1704_v22 }
 0x1d7   :  { %v4663_v19 = vadd.f32 %v1642_v21, %v1498_v28 }
 0x1d8   :  { %v1503_v61 = vadd.f32 %v2695_v57, %v4608_v41  ;;  %v2696_v25 = vpop.f32.mrb[112].mxu0 }
 0x1d9   :  { %v2762_v30 = vpop.f32.mrb[112].mxu1  ;;  %1708 = vadd.xlane.f32.xlu1 %v1707_v1  ;;  %v2697_v32 = vpop.f32.mrb[113].mxu0  ;;  %v1710_v3 = vsel %vm1691_vm1, %v4663_v19, 0.0 }
 0x1da   :  { %v2698_v27 = vadd.f32 %v2697_v32, %v2696_v25  ;;  %v1652_v31 = vpop.f32.mrb[113].mxu1  ;;  %1711 = vadd.xlane.f32.xlu0 %v1710_v3  ;;  %v4670_v8 = vadd.f32 %v2759_v15, %v1503_v61 }
 0x1dc   :  { %v1508_v34 = vadd.f32 %v2698_v27, %v4611_v50  ;;  %v2699_v10 = vpop.f32.mrb[114].mxu0  ;;  %v1713_v41 = vsel %vm1691_vm1, %v4670_v8, 0.0 }
 0x1dd   :  { %v2765_v37 = vpop.f32.mrb[114].mxu1  ;;  %v2700_v13 = vpop.f32.mrb[115].mxu0  ;;  %1714 = vadd.xlane.f32.xlu1 %v1713_v41 }
 0x1de   :  { %v4675_v36 = vadd.f32 %v1652_v31, %v1508_v34  ;;  %v2701_v40 = vadd.f32 %v2700_v13, %v2699_v10  ;;  %v1662_v18 = vpop.f32.mrb[115].mxu1 }
 0x1e0   :  { %v1513_v43 = vadd.f32 %v2701_v40, %v4614_v60  ;;  %v2702_v20 = vpop.f32.mrb[116].mxu0  ;;  %v1716_v45 = vsel %vm1691_vm1, %v4675_v36, 0.0 }
 0x1e1   :  { %v2768_v24 = vpop.f32.mrb[116].mxu1  ;;  %v2703_v46 = vpop.f32.mrb[117].mxu0  ;;  %1717 = vadd.xlane.f32.xlu0 %v1716_v45 }
 0x1e2   :  { %v4681_v50 = vadd.f32 %v2768_v24, %v4630_v48  ;;  %v2704_v59 = vadd.f32 %v2703_v46, %v2702_v20  ;;  %v1672_v49 = vpop.f32.mrb[117].mxu1  ;;  %v4683_v29 = vadd.f32 %v2762_v30, %v1513_v43 }
 0x1e3   :  { %v4686_v52 = vadd.f32 %v1672_v49, %v4627_v39 }
 0x1e4   :  { %v1518_v53 = vadd.f32 %v2704_v59, %v4617_v5  ;;  %v2705_v60 = vpop.f32.mrb[118].mxu0  ;;  %v1731_v33 = vsel %vm1691_vm1, %v4681_v50, 0.0  ;;  %v1719_v42 = vsel %vm1691_vm1, %v4683_v29, 0.0 }
 0x1e5   :  { %v2771_v6 = vpop.f32.mrb[118].mxu1  ;;  %1732 = vadd.xlane.f32.xlu1 %v1731_v33  ;;  %v2706_v58 = vpop.f32.mrb[119].mxu0  ;;  %v1728_v48 = vsel %vm1691_vm1, %v4686_v52, 0.0 }
 0x1e6   :  { %v4694_v2 = vadd.f32 %v2771_v6, %v4636_v26  ;;  %v2707_v7 = vadd.f32 %v2706_v58, %v2705_v60  ;;  %v1682_v38 = vpop.f32.mrb[119].mxu1  ;;  %1729 = vadd.xlane.f32.xlu0 %v1728_v48  ;;  %v4696_v39 = vadd.f32 %v1662_v18, %v1518_v53 }
 0x1e7   :  { %v4699_v5 = vadd.f32 %v1682_v38, %v4633_v55 }
 0x1e8   :  { %v1523_v0 = vadd.f32 %v2707_v7, %v4620_v16  ;;  %v1722_v17 = vsel %vm1691_vm1, %v4696_v39, 0.0  ;;  %v1737_v4 = vsel %vm1691_vm1, %v4694_v2, 0.0 }
 0x1e9   :  { %1720 = vadd.xlane.f32.xlu1 %v1719_v42  ;;  %v1734_v55 = vsel %vm1691_vm1, %v4699_v5, 0.0 }
 0x1ea   :  { %1723 = vadd.xlane.f32.xlu0 %v1722_v17  ;;  %v4706_v26 = vadd.f32 %v2765_v37, %v1523_v0 }
 0x1ec   :  { %v1725_v16 = vsel %vm1691_vm1, %v4706_v26, 0.0 }
 0x1ed   :  { %1738 = vadd.xlane.f32.xlu1 %v1737_v4 }
 0x1ee   :  { %1735 = vadd.xlane.f32.xlu0 %v1734_v55 }
 0x1f1   :  { %1726 = vadd.xlane.f32.xlu1 %v1725_v16 }
 0x25a   :  { %v1697_v12 = vpop.xlane.xlu0 %1696 }
 0x25b   :  { %v1741_v47 = vmul.f32 0.020408163, %v1697_v12 }
 0x25d   :  { %v4717_v11 = vsub.f32 %v4638_v63, %v1741_v47 }
 0x25e   :  { %v1703_v51 = vpop.xlane.xlu1 %1702  ;;  %v1694_v23 = vpop.xlane.xlu0 %1693 }
 0x25f   :  { %v1743_v28 = vmul.f32 0.020408163, %v1703_v51  ;;  %v1740_v15 = vmul.f32 0.020408163, %v1694_v23  ;;  %v1773_v54 = vmul.f32 %v4717_v11, %v4717_v11 }
 0x261   :  { %v4722_v22 = vsub.f32 %v4645_v35, %v1743_v28  ;;  %v4725_v57 = vsub.f32 %v4640_v56, %v1740_v15  ;;  %v1791_v21 = vsel %vm1691_vm1, %v1773_v54, 0.0 }
 0x262   :  { %v1700_v61 = vpop.xlane.xlu1 %1699  ;;  %1792 = vadd.xlane.f32.xlu1 %v1791_v21 }
 0x263   :  { %v1742_v25 = vmul.f32 0.020408163, %v1700_v61  ;;  %v1706_v63 = vpop.xlane.xlu0 %1705  ;;  %v1775_v1 = vmul.f32 %v4722_v22, %v4722_v22  ;;  %v1772_v30 = vmul.f32 %v4725_v57, %v4725_v57 }
 0x264   :  { %v1744_v32 = vmul.f32 0.020408163, %v1706_v63 }
 0x265   :  { %v4733_v3 = vsub.f32 %v4647_v62, %v1742_v25  ;;  %v1797_v35 = vsel %vm1691_vm1, %v1775_v1, 0.0  ;;  %v1788_v56 = vsel %vm1691_vm1, %v1772_v30, 0.0 }
 0x266   :  { %v4738_v27 = vsub.f32 %v4656_v9, %v1744_v32  ;;  %v1709_v31 = vpop.xlane.xlu1 %1708  ;;  %1798 = vadd.xlane.f32.xlu1 %v1797_v35  ;;  %1789 = vadd.xlane.f32.xlu0 %v1788_v56  ;;  %v4815_v35 = vld [vmem:[%s5002_s2 + $0x10] sm:$0xff]  ;;  %v1885_v56 = vld [vmem:[%s5002_s2 + $0x8] sm:$0xff] }
 0x267   :  { %v1745_v34 = vmul.f32 0.020408163, %v1709_v31  ;;  %v1712_v10 = vpop.xlane.xlu0 %1711  ;;  %v1774_v41 = vmul.f32 %v4733_v3, %v4733_v3  ;;  %v4824_v31 = vld [vmem:[%s5002_s2 + $0x18] sm:$0xff] }
 0x268   :  { %v1746_v37 = vmul.f32 0.020408163, %v1712_v10  ;;  %v1776_v40 = vmul.f32 %v4738_v27, %v4738_v27  ;;  %v4835_v10 = vld [vmem:[%s5002_s2 + $0x28] sm:$0xff] }
 0x269   :  { %v4743_v13 = vsub.f32 %v4654_v14, %v1745_v34  ;;  %v1794_v62 = vsel %vm1691_vm1, %v1774_v41, 0.0  ;;  %v4829_v34 = vld [vmem:[%s5002_s2 + $0x20] sm:$0xff]  ;;  %v4841_v41 = vld [vmem:[%s5002_s2 + $0x30] sm:$0xff] }
 0x26a   :  { %v4749_v9 = vsub.f32 %v4663_v19, %v1746_v37  ;;  %1795 = vadd.xlane.f32.xlu0 %v1794_v62  ;;  %v1715_v18 = vpop.xlane.xlu1 %1714  ;;  %v1800_v24 = vsel %vm1691_vm1, %v1776_v40, 0.0  ;;  %v4847_v37 = vld [vmem:[%s5002_s2 + $0x38] sm:$0xff]  ;;  %v4853_v62 = vld [vmem:[%s5002_s2 + $0x40] sm:$0xff]  ;;  %v4860_v40 = vld [vmem:[%s5002_s2 + $0x50] sm:$0xff] }
 0x26b   :  { %v1747_v43 = vmul.f32 0.020408163, %v1715_v18  ;;  %v1777_v20 = vmul.f32 %v4743_v13, %v4743_v13  ;;  %v4866_v18 = vld [vmem:[%s5002_s2 + $0x60] sm:$0xff] }
 0x26c   :  { %v1778_v46 = vmul.f32 %v4749_v9, %v4749_v9 }
 0x26d   :  { %v4754_v45 = vsub.f32 %v4670_v8, %v1747_v43  ;;  %v1803_v14 = vsel %vm1691_vm1, %v1777_v20, 0.0  ;;  %v3061_v43 = vmov 0  }
 0x26e   :  { %1804 = vadd.xlane.f32.xlu1 %v1803_v14  ;;  %1801 = vadd.xlane.f32.xlu0 %v1800_v24  ;;  %v1718_v19 = vpop.xlane.xlu0 %1717  ;;  %v1806_v8 = vsel %vm1691_vm1, %v1778_v46, 0.0 }
 0x26f   :  { %v1748_v59 = vmul.f32 0.020408163, %v1718_v19  ;;  %v1779_v49 = vmul.f32 %v4754_v45, %v4754_v45 }
 0x271   :  { %v4763_v53 = vsub.f32 %v4675_v36, %v1748_v59  ;;  %v1809_v60 = vsel %vm1691_vm1, %v1779_v49, 0.0  ;;  %v4878_v59 = vld [vmem:[%s5002_s2 + $0x48] sm:$0xff]  ;;  %v4884_v49 = vld [vmem:[%s5002_s2 + $0x58] sm:$0xff] }
 0x272   :  { %v1733_v33 = vpop.xlane.xlu1 %1732  ;;  %1807 = vadd.xlane.f32.xlu0 %v1806_v8  ;;  %1810 = vadd.xlane.f32.xlu1 %v1809_v60 }
 0x273   :  { %v1753_v6 = vmul.f32 0.020408163, %v1733_v33  ;;  %v1730_v58 = vpop.xlane.xlu0 %1729  ;;  %v1780_v48 = vmul.f32 %v4763_v53, %v4763_v53 }
 0x274   :  { %v1752_v7 = vmul.f32 0.020408163, %v1730_v58 }
 0x275   :  { %v4770_v38 = vsub.f32 %v4681_v50, %v1753_v6  ;;  %v1812_v0 = vsel %vm1691_vm1, %v1780_v48, 0.0 }
 0x276   :  { %v4774_v36 = vsub.f32 %v4686_v52, %v1752_v7  ;;  %v1721_v42 = vpop.xlane.xlu1 %1720  ;;  %1813 = vadd.xlane.f32.xlu0 %v1812_v0 }
 0x277   :  { %v1749_v17 = vmul.f32 0.020408163, %v1721_v42  ;;  %v1724_v4 = vpop.xlane.xlu0 %1723  ;;  %v1785_v55 = vmul.f32 %v4770_v38, %v4770_v38 }
 0x278   :  { %v1750_v16 = vmul.f32 0.020408163, %v1724_v4  ;;  %v1784_v12 = vmul.f32 %v4774_v36, %v4774_v36 }
 0x279   :  { %v4781_v47 = vsub.f32 %v4683_v29, %v1749_v17  ;;  %v1827_v50 = vsel %vm1691_vm1, %v1785_v55, 0.0 }
 0x27a   :  { %v4785_v51 = vsub.f32 %v4696_v39, %v1750_v16  ;;  %v1739_v52 = vpop.xlane.xlu1 %1738  ;;  %1828 = vadd.xlane.f32.xlu1 %v1827_v50  ;;  %v1824_v23 = vsel %vm1691_vm1, %v1784_v12, 0.0 }
 0x27b   :  { %v1755_v28 = vmul.f32 0.020408163, %v1739_v52  ;;  %1825 = vadd.xlane.f32.xlu0 %v1824_v23  ;;  %v1736_v15 = vpop.xlane.xlu0 %1735  ;;  %v1781_v54 = vmul.f32 %v4781_v47, %v4781_v47 }
 0x27c   :  { %v1754_v21 = vmul.f32 0.020408163, %v1736_v15  ;;  %v1782_v29 = vmul.f32 %v4785_v51, %v4785_v51 }
 0x27d   :  { %v4793_v61 = vsub.f32 %v4694_v2, %v1755_v28  ;;  %v1815_v39 = vsel %vm1691_vm1, %v1781_v54, 0.0 }
 0x27e   :  { %v4797_v25 = vsub.f32 %v4699_v5, %v1754_v21  ;;  %1816 = vadd.xlane.f32.xlu1 %v1815_v39  ;;  %v1818_v63 = vsel %vm1691_vm1, %v1782_v29, 0.0  ;;  %v4809_v5 = vld [vmem:[%s5002_s2] sm:$0xff]  ;;  %v1727_v20 = vpop.xlane.xlu1 %1726 }
 0x27f   :  { %1819 = vadd.xlane.f32.xlu0 %v1818_v63  ;;  %v1787_v1 = vmul.f32 %v4793_v61, %v4793_v61  ;;  %v1751_v14 = vmul.f32 0.020408163, %v1727_v20 }
 0x280   :  { %v1786_v30 = vmul.f32 %v4797_v25, %v4797_v25 }
 0x281   :  { %v1833_v32 = vsel %vm1691_vm1, %v1787_v1, 0.0  ;;  %v4870_v24 = vsub.f32 %v4706_v26, %v1751_v14  ;;  %v4890_v26 = vld [vmem:[%s5002_s2 + $0x68] sm:$0xff] }
 0x282   :  { %1834 = vadd.xlane.f32.xlu1 %v1833_v32  ;;  %v1830_v2 = vsel %vm1691_vm1, %v1786_v30, 0.0 }
 0x283   :  { %1831 = vadd.xlane.f32.xlu0 %v1830_v2  ;;  %v1783_v46 = vmul.f32 %v4870_v24, %v4870_v24 }
 0x285   :  { %v1821_v19 = vsel %vm1691_vm1, %v1783_v46, 0.0 }
 0x293   :  { %2014 = vperm.xlu1 %3022, %v4809_v5  }
 0x297   :  { %2024 = vperm.xlu1 %3022, %v4815_v35  }
 0x299   :  { %2019 = vperm.xlu0 %3023, %v1885_v56  }
 0x29b   :  { %2029 = vperm.xlu1 %3022, %v4824_v31  }
 0x29d   :  { %2034 = vperm.xlu0 %3023, %v4829_v34  }
 0x29f   :  { %2039 = vperm.xlu1 %3022, %v4835_v10  }
 0x2a1   :  { %2044 = vperm.xlu0 %3023, %v4841_v41  }
 0x2a3   :  { %2049 = vperm.xlu1 %3022, %v4847_v37  }
 0x2a5   :  { %2054 = vperm.xlu0 %3023, %v4853_v62  }
 0x2a9   :  { %2064 = vperm.xlu0 %3023, %v4860_v40  }
 0x2ad   :  { %2074 = vperm.xlu0 %3023, %v4866_v18  }
 0x2b1   :  { %3025 = vset.pattern.permute.xlu0 %v3061_v43 }
 0x2c7   :  { %1822 = vadd.xlane.f32.xlu1 %v1821_v19 }
 0x2d8   :  { %2059 = vperm.xlu1 %3022, %v4878_v59  }
 0x2dc   :  { %2069 = vperm.xlu1 %3022, %v4884_v49  }
 0x2e0   :  { %2079 = vperm.xlu1 %3022, %v4890_v26  }
 0x2e4   :  { %3024 = vset.pattern.permute.xlu1 %v3061_v43 }
 0x2ef   :  { %v1793_v8 = vpop.xlane.xlu1 %1792 }
 0x2f0   :  { %v1837_v60 = vmul.f32 0.020408163, %v1793_v8 }
 0x2f2   :  { %v1853_v33 = vadd.f32 1e-05, %v1837_v60 }
 0x2f3   :  { %v1799_v6 = vpop.xlane.xlu1 %1798  ;;  %v1790_v58 = vpop.xlane.xlu0 %1789 }
 0x2f4   :  { %3028 = vrsqrt.f32 %v1853_v33  ;;  %v1839_v48 = vmul.f32 0.020408163, %v1799_v6  ;;  %v1836_v7 = vmul.f32 0.020408163, %v1790_v58 }
 0x2f6   :  { %v1855_v0 = vadd.f32 1e-05, %v1839_v48  ;;  %v1852_v42 = vadd.f32 1e-05, %v1836_v7 }
 0x2f7   :  { %v1796_v17 = vpop.xlane.xlu0 %1795 }
 0x2f8   :  { %3030 = vrsqrt.f32 %v1855_v0  ;;  %v1838_v4 = vmul.f32 0.020408163, %v1796_v17 }
 0x2f9   :  { %3032 = vrsqrt.f32 %v1852_v42 }
 0x2fa   :  { %v1854_v55 = vadd.f32 1e-05, %v1838_v4 }
 0x2fb   :  { %v1805_v16 = vpop.xlane.xlu1 %1804  ;;  %v1802_v12 = vpop.xlane.xlu0 %1801 }
 0x2fc   :  { %3034 = vrsqrt.f32 %v1854_v55  ;;  %v1841_v50 = vmul.f32 0.020408163, %v1805_v16  ;;  %v1840_v52 = vmul.f32 0.020408163, %v1802_v12 }
 0x2fe   :  { %v3029_v23 = vpop.eup %3028  ;;  %v1856_v28 = vadd.f32 1e-05, %v1840_v52  ;;  %v1857_v15 = vadd.f32 1e-05, %v1841_v50 }
 0x2ff   :  { %v1808_v54 = vpop.xlane.xlu0 %1807  ;;  %v1901_v21 = vmul.f32 %v3029_v23, %v1885_v56  ;;  %v1811_v39 = vpop.xlane.xlu1 %1810 }
 0x300   :  { %v1842_v29 = vmul.f32 0.020408163, %v1808_v54  ;;  %3036 = vrsqrt.f32 %v1856_v28  ;;  %v1843_v32 = vmul.f32 0.020408163, %v1811_v39 }
 0x301   :  { %1923 = vperm.xlu1 %3024, %v1901_v21   ;;  %3038 = vrsqrt.f32 %v1857_v15 }
 0x302   :  { %v3031_v63 = vpop.eup %3030  ;;  %v1858_v30 = vadd.f32 1e-05, %v1842_v29  ;;  %v1859_v46 = vadd.f32 1e-05, %v1843_v32 }
 0x303   :  { %v3033_v1 = vpop.eup %3032  ;;  %v1814_v2 = vpop.xlane.xlu0 %1813  ;;  %v1903_v43 = vmul.f32 %v3031_v63, %v4824_v31 }
 0x304   :  { %v1900_v20 = vmul.f32 %v3033_v1, %v4809_v5  ;;  %3040 = vrsqrt.f32 %v1858_v30  ;;  %v1844_v56 = vmul.f32 0.020408163, %v1814_v2 }
 0x305   :  { %1933 = vperm.xlu1 %3024, %v1903_v43   ;;  %3042 = vrsqrt.f32 %v1859_v46 }
 0x306   :  { %v3035_v14 = vpop.eup %3034  ;;  %1918 = vperm.xlu0 %3025, %v1900_v20   ;;  %v1860_v48 = vadd.f32 1e-05, %v1844_v56 }
 0x307   :  { %v1829_v19 = vpop.xlane.xlu1 %1828  ;;  %v1902_v8 = vmul.f32 %v3035_v14, %v4815_v35 }
 0x308   :  { %v1849_v60 = vmul.f32 0.020408163, %v1829_v19  ;;  %v1826_v33 = vpop.xlane.xlu0 %1825 }
 0x309   :  { %1928 = vperm.xlu1 %3024, %v1902_v8   ;;  %v1848_v7 = vmul.f32 0.020408163, %v1826_v33 }
 0x30a   :  { %v1865_v6 = vadd.f32 1e-05, %v1849_v60  ;;  %v3037_v58 = vpop.eup %3036 }
 0x30b   :  { %v1817_v31 = vpop.xlane.xlu1 %1816  ;;  %v1904_v42 = vmul.f32 %v3037_v58, %v4829_v34  ;;  %v3039_v17 = vpop.eup %3038  ;;  %v1864_v55 = vadd.f32 1e-05, %v1848_v7 }
 0x30c   :  { %3044 = vrsqrt.f32 %v1865_v6  ;;  %v1845_v5 = vmul.f32 0.020408163, %v1817_v31  ;;  %v1820_v0 = vpop.xlane.xlu0 %1819  ;;  %v1905_v52 = vmul.f32 %v3039_v17, %v4835_v10 }
 0x30d   :  { %1938 = vperm.xlu1 %3024, %v1904_v42   ;;  %3046 = vrsqrt.f32 %v1860_v48  ;;  %v1846_v35 = vmul.f32 0.020408163, %v1820_v0 }
 0x30e   :  { %v1861_v4 = vadd.f32 1e-05, %v1845_v5  ;;  %v3041_v23 = vpop.eup %3040 }
 0x30f   :  { %v1835_v16 = vpop.xlane.xlu1 %1834  ;;  %v1862_v15 = vadd.f32 1e-05, %v1846_v35  ;;  %v1906_v34 = vmul.f32 %v3041_v23, %v4841_v41  ;;  %v3043_v21 = vpop.eup %3042  ;;  %v1899_v41 = vld [vmem:[%s5002_s2 + $0x78] sm:$0xff] }
 0x310   :  { %3048 = vrsqrt.f32 %v1861_v4  ;;  %v1851_v12 = vmul.f32 0.020408163, %v1835_v16  ;;  %v1832_v50 = vpop.xlane.xlu0 %1831  ;;  %v1907_v1 = vmul.f32 %v3043_v21, %v4847_v37 }
 0x311   :  { %1943 = vperm.xlu1 %3024, %v1905_v52   ;;  %3050 = vrsqrt.f32 %v1864_v55  ;;  %v1850_v54 = vmul.f32 0.020408163, %v1832_v50 }
 0x312   :  { %v1867_v28 = vadd.f32 1e-05, %v1851_v12 }
 0x313   :  { %v1866_v39 = vadd.f32 1e-05, %v1850_v54  ;;  %v2015_v19 = vpop.permute.xlu1 %2014 }
 0x314   :  { %3052 = vrsqrt.f32 %v1867_v28 }
 0x315   :  { %1948 = vperm.xlu1 %3024, %v1906_v34   ;;  %3054 = vrsqrt.f32 %v1862_v15 }
 0x316   :  { %v3045_v29 = vpop.eup %3044  ;;  %3056 = vrsqrt.f32 %v1866_v39 }
 0x317   :  { %v1913_v63 = vmul.f32 %v3045_v29, %v4890_v26  ;;  %v3047_v30 = vpop.eup %3046  ;;  %v2025_v8 = vpop.permute.xlu1 %2024 }
 0x318   :  { %v1908_v2 = vmul.f32 %v3047_v30, %v4853_v62  ;;  %v1898_v62 = vld [vmem:[%s5002_s2 + $0x70] sm:$0xff] }
 0x319   :  { %1983 = vperm.xlu0 %3025, %v1913_v63   ;;  %1953 = vperm.xlu1 %3024, %v1907_v1  }
 0x31a   :  { %v3049_v10 = vpop.eup %3048 }
 0x31b   :  { %v1909_v32 = vmul.f32 %v3049_v10, %v4878_v59  ;;  %v3051_v43 = vpop.eup %3050  ;;  %v2030_v60 = vpop.permute.xlu1 %2029 }
 0x31c   :  { %v1912_v37 = vmul.f32 %v3051_v43, %v4866_v18 }
 0x31d   :  { %1963 = vperm.xlu0 %3025, %v1909_v32   ;;  %1958 = vperm.xlu1 %3024, %v1908_v2  }
 0x31e   :  { %v3053_v20 = vpop.eup %3052 }
 0x31f   :  { %v1915_v26 = vmul.f32 %v3053_v20, %v1899_v41  ;;  %v3055_v14 = vpop.eup %3054  ;;  %v2040_v18 = vpop.permute.xlu1 %2039 }
 0x320   :  { %v1910_v46 = vmul.f32 %v3055_v14, %v4860_v40  ;;  %v3057_v56 = vpop.eup %3056  ;;  %v2020_v40 = vpop.permute.xlu0 %2019 }
 0x321   :  { %1993 = vperm.xlu0 %3025, %v1915_v26   ;;  %1978 = vperm.xlu1 %3024, %v1912_v37   ;;  %v1914_v59 = vmul.f32 %v3057_v56, %v1898_v62 }
 0x323   :  { %v2050_v33 = vpop.permute.xlu1 %2049 }
 0x324   :  { %v2035_v5 = vpop.permute.xlu0 %2034 }
 0x325   :  { %1968 = vperm.xlu1 %3024, %v1910_v46  }
 0x328   :  { %v2045_v0 = vpop.permute.xlu0 %2044 }
 0x329   :  { %1988 = vperm.xlu1 %3024, %v1914_v59  }
 0x32c   :  { %v2055_v17 = vpop.permute.xlu0 %2054 }
 0x32d   :  { %3027 = vset.pattern.permute.xlu1 %v3060_v44 }
 0x32e   :  { %2089 = vperm.xlu1 %3027, %v1899_v41  }
 0x330   :  { %v4916_v55 = vpop.permute.xlu0 %2064 }
 0x334   :  { %v2075_v16 = vpop.permute.xlu0 %2074 }
 0x354   :  { %v1823_v6 = vpop.xlane.xlu1 %1822 }
 0x355   :  { %v1847_v58 = vmul.f32 0.020408163, %v1823_v6 }
 0x357   :  { %v1863_v48 = vadd.f32 1e-05, %v1847_v58 }
 0x358   :  { %v2060_v42 = vpop.permute.xlu1 %2059 }
 0x359   :  { %3058 = vrsqrt.f32 %v1863_v48 }
 0x35c   :  { %v4914_v4 = vpop.permute.xlu1 %2069 }
 0x360   :  { %v2080_v35 = vpop.permute.xlu1 %2079 }
 0x363   :  { %v3059_v7 = vpop.eup %3058 }
 0x364   :  { %v1911_v31 = vmul.f32 %v3059_v7, %v4884_v49 }
 0x366   :  { %1973 = vperm.xlu0 %3025, %v1911_v31  }
 0x36a   :  { %3026 = vset.pattern.permute.xlu0 %v3060_v44 }
 0x36b   :  { %2084 = vperm.xlu0 %3026, %v1898_v62  }
 0x380   :  { %v1924_v12 = vpop.permute.xlu1 %1923 }
 0x381   :  { %v1997_v50 = vmul.f32 %v1924_v12, %v4717_v11 }
 0x383   :  { %v2093_v52 = vadd.f32 %v2020_v40, %v1997_v50 }
 0x384   :  { %v1934_v23 = vpop.permute.xlu1 %1933 }
 0x385   :  { %v2109_v49 = vmax.f32 %v2093_v52, 0.0  ;;  %v1999_v28 = vmul.f32 %v1934_v23, %v4722_v22  ;;  %v1919_v15 = vpop.permute.xlu0 %1918 }
 0x386   :  { %v1996_v44 = vmul.f32 %v1919_v15, %v4725_v57 }
 0x387   :  { %2125 = vst.msk [vmem:[%s5003_s3 + $0x8] sm:$0xff] %vm1691_vm1, %v2109_v49  ;;  %v2095_v54 = vadd.f32 %v2030_v60, %v1999_v28 }
 0x388   :  { %v2092_v34 = vadd.f32 %v2015_v19, %v1996_v44  ;;  %v1929_v21 = vpop.permute.xlu1 %1928 }
 0x389   :  { %v2111_v29 = vmax.f32 %v2095_v54, 0.0  ;;  %v1998_v39 = vmul.f32 %v1929_v21, %v4733_v3 }
 0x38a   :  { %v2108_v11 = vmax.f32 %v2092_v34, 0.0 }
 0x38b   :  { %2127 = vst.msk [vmem:[%s5003_s3 + $0x18] sm:$0xff] %vm1691_vm1, %v2111_v29  ;;  %v2094_v22 = vadd.f32 %v2025_v8, %v1998_v39 }
 0x38c   :  { %2124 = vst.msk [vmem:[%s5003_s3] sm:$0xff] %vm1691_vm1, %v2108_v11  ;;  %v1939_v63 = vpop.permute.xlu1 %1938 }
 0x38d   :  { %v2110_v57 = vmax.f32 %v2094_v22, 0.0  ;;  %v2000_v1 = vmul.f32 %v1939_v63, %v4738_v27 }
 0x38f   :  { %2126 = vst.msk [vmem:[%s5003_s3 + $0x10] sm:$0xff] %vm1691_vm1, %v2110_v57  ;;  %v2096_v3 = vadd.f32 %v2035_v5, %v2000_v1 }
 0x390   :  { %v1944_v30 = vpop.permute.xlu1 %1943 }
 0x391   :  { %v2112_v10 = vmax.f32 %v2096_v3, 0.0  ;;  %v2001_v32 = vmul.f32 %v1944_v30, %v4743_v13 }
 0x393   :  { %2128 = vst.msk [vmem:[%s5003_s3 + $0x20] sm:$0xff] %vm1691_vm1, %v2112_v10  ;;  %v2097_v2 = vadd.f32 %v2040_v18, %v2001_v32 }
 0x394   :  { %v1949_v41 = vpop.permute.xlu1 %1948 }
 0x395   :  { %v2113_v43 = vmax.f32 %v2097_v2, 0.0  ;;  %v2002_v27 = vmul.f32 %v1949_v41, %v4749_v9 }
 0x397   :  { %2129 = vst.msk [vmem:[%s5003_s3 + $0x28] sm:$0xff] %vm1691_vm1, %v2113_v43  ;;  %v2098_v20 = vadd.f32 %v2045_v0, %v2002_v27 }
 0x398   :  { %v1984_v26 = vpop.permute.xlu0 %1983  ;;  %v1954_v37 = vpop.permute.xlu1 %1953 }
 0x399   :  { %v2009_v13 = vmul.f32 %v1984_v26, %v4770_v38  ;;  %v2114_v14 = vmax.f32 %v2098_v20, 0.0  ;;  %v2003_v46 = vmul.f32 %v1954_v37, %v4754_v45 }
 0x39b   :  { %v2105_v56 = vadd.f32 %v2080_v35, %v2009_v13  ;;  %2130 = vst.msk [vmem:[%s5003_s3 + $0x30] sm:$0xff] %vm1691_vm1, %v2114_v14  ;;  %v2099_v9 = vadd.f32 %v2050_v33, %v2003_v46 }
 0x39c   :  { %v1964_v62 = vpop.permute.xlu0 %1963  ;;  %v1959_v19 = vpop.permute.xlu1 %1958 }
 0x39d   :  { %v2121_v59 = vmax.f32 %v2105_v56, 0.0  ;;  %v2005_v8 = vmul.f32 %v1964_v62, %v4781_v47  ;;  %v2115_v60 = vmax.f32 %v2099_v9, 0.0  ;;  %v2004_v18 = vmul.f32 %v1959_v19, %v4763_v53 }
 0x39f   :  { %2137 = vst.msk [vmem:[%s5003_s3 + $0x68] sm:$0xff] %vm1691_vm1, %v2121_v59  ;;  %v2101_v45 = vadd.f32 %v2060_v42, %v2005_v8  ;;  %2131 = vst.msk [vmem:[%s5003_s3 + $0x38] sm:$0xff] %vm1691_vm1, %v2115_v60  ;;  %v2100_v38 = vadd.f32 %v2055_v17, %v2004_v18 }
 0x3a0   :  { %v1979_v6 = vpop.permute.xlu1 %1978  ;;  %v1994_v5 = vpop.permute.xlu0 %1993 }
 0x3a1   :  { %v2117_v33 = vmax.f32 %v2101_v45, 0.0  ;;  %v2116_v58 = vmax.f32 %v2100_v38, 0.0  ;;  %v2008_v47 = vmul.f32 %v1979_v6, %v4774_v36  ;;  %v2011_v42 = vmul.f32 %v1994_v5, %v4793_v61 }
 0x3a3   :  { %2133 = vst.msk [vmem:[%s5003_s3 + $0x48] sm:$0xff] %vm1691_vm1, %v2117_v33  ;;  %2132 = vst.msk [vmem:[%s5003_s3 + $0x40] sm:$0xff] %vm1691_vm1, %v2116_v58  ;;  %v2104_v53 = vadd.f32 %v2075_v16, %v2008_v47 }
 0x3a4   :  { %v1969_v48 = vpop.permute.xlu1 %1968 }
 0x3a5   :  { %v2120_v40 = vmax.f32 %v2104_v53, 0.0  ;;  %v2006_v7 = vmul.f32 %v1969_v48, %v4785_v51 }
 0x3a7   :  { %2136 = vst.msk [vmem:[%s5003_s3 + $0x60] sm:$0xff] %vm1691_vm1, %v2120_v40  ;;  %v2102_v36 = vadd.f32 %v4916_v55, %v2006_v7 }
 0x3a8   :  { %v1989_v31 = vpop.permute.xlu1 %1988 }
 0x3a9   :  { %v2118_v0 = vmax.f32 %v2102_v36, 0.0  ;;  %v2010_v50 = vmul.f32 %v1989_v31, %v4797_v25 }
 0x3ab   :  { %2134 = vst.msk [vmem:[%s5003_s3 + $0x50] sm:$0xff] %vm1691_vm1, %v2118_v0 }
 0x3ad   :  { %v2090_v17 = vpop.permute.xlu1 %2089 }
 0x3ae   :  { %v2107_v35 = vadd.f32 %v2090_v17, %v2011_v42 }
 0x3b0   :  { %v2123_v51 = vmax.f32 %v2107_v35, 0.0 }
 0x3b2   :  { %2139 = vst.msk [vmem:[%s5003_s3 + $0x78] sm:$0xff] %vm1691_vm1, %v2123_v51 }
 0x3e5   :  { %v1974_v16 = vpop.permute.xlu0 %1973 }
 0x3e6   :  { %v2007_v55 = vmul.f32 %v1974_v16, %v4870_v24 }
 0x3e8   :  { %v2103_v12 = vadd.f32 %v4914_v4, %v2007_v55 }
 0x3ea   :  { %v2119_v52 = vmax.f32 %v2103_v12, 0.0  ;;  %v2085_v23 = vpop.permute.xlu0 %2084 }
 0x3eb   :  { %v2106_v49 = vadd.f32 %v2085_v23, %v2010_v50 }
 0x3ec   :  { %2135 = vst.msk [vmem:[%s5003_s3 + $0x58] sm:$0xff] %vm1691_vm1, %v2119_v52 }
 0x3ed   :  { %v2122_v61 = vmax.f32 %v2106_v49, 0.0 }
 0x3ef   :  { %2138 = vst.msk [vmem:[%s5003_s3 + $0x70] sm:$0xff] %vm1691_vm1, %v2122_v61 }

</bundles_post_ra>
